<compile_context>
chip_gen: v6e
topology: v6e:2x2x1
jax: 0.10.0
libtpu: 0.0.40
codegen_flags: <defaults>
</compile_context>

<pallas_src>
import math
import functools

import jax
import jax.numpy as jnp
from jax import lax
from jax.experimental import pallas as pl
from jax.experimental.pallas import tpu as pltpu

# ---- model config (small, consistent with the module) ----
N_HEAD = 4
N_EMBD = 32
BLOCK_SIZE = 8          # max sequence length (causal mask size)
EPS = 1e-5              # nn.LayerNorm default
SEQS_PER_STEP = 32      # max sequences fused per grid step -> up to 32*8 = 256 rows
COMPUTE_DTYPE = jnp.bfloat16   # MXU operand dtype (accumulation stays f32)
NEG_BIAS = -1e9         # additive mask value (finite: no inf-inf risk)


def _layernorm(x, g, b):
    mu = jnp.mean(x, axis=-1, keepdims=True)
    var = jnp.mean((x - mu) ** 2, axis=-1, keepdims=True)
    return (x - mu) * lax.rsqrt(var + EPS) * g + b


def _gelu_exact(x):
    # nn.GELU() default is the exact erf-based GELU
    return 0.5 * x * (1.0 + lax.erf(x * (1.0 / math.sqrt(2.0))))


def block_kernel(x_ref,
                 ln1_g_ref, ln1_b_ref,
                 wq_ref, bq_ref, wk_ref, bk_ref, wv_ref, bv_ref,
                 wproj_ref, bproj_ref,
                 ln2_g_ref, ln2_b_ref,
                 wfc_ref, bfc_ref, wmp_ref, bmp_ref,
                 mask_ref,
                 out_ref, *, n_head, compute_dtype):
    cdt = compute_dtype
    x3 = x_ref[...].astype(jnp.float32)                 # (BB, T, C)
    BB, T, C = x3.shape
    R = BB * T
    hd = C // n_head

    # Leading-dim collapse (last dim unchanged) -> no relayout.
    x = x3.reshape(R, C)

    # ---------------- attention branch ----------------
    h = _layernorm(x, ln1_g_ref[0], ln1_b_ref[0]).astype(cdt)   # (R, C) bf16

    # Precomputed additive causal-mask bias; broadcast once for all heads.
    mask_b = jnp.broadcast_to(mask_ref[...], (BB, T, T))        # (BB, T, T) f32

    attn_out = jnp.zeros((R, C), jnp.float32)
    for hh in range(n_head):                            # static unroll, 4 heads
        # Per-head projections from weight-side slices; 1/sqrt(hd) is already
        # folded into wq/bq in the wrapper, so scores need no extra scale.
        qh = jnp.dot(h, wq_ref[hh], preferred_element_type=jnp.float32) + bq_ref[hh]
        kh = jnp.dot(h, wk_ref[hh], preferred_element_type=jnp.float32) + bk_ref[hh]
        vh = jnp.dot(h, wv_ref[hh], preferred_element_type=jnp.float32) + bv_ref[hh]
        qh = qh.astype(cdt).reshape(BB, T, hd)
        kh = kh.astype(cdt).reshape(BB, T, hd)
        vh = vh.astype(cdt).reshape(BB, T, hd)

        # Per-sequence batched attention: scores are only (BB, T, T).
        att = jnp.einsum('bqd,bkd->bqk', qh, kh,
                         preferred_element_type=jnp.float32)    # (BB, T, T) f32
        att = att + mask_b
        att = att - jnp.max(att, axis=-1, keepdims=True)
        p = jnp.exp(att)
        denom = jnp.sum(p, axis=-1, keepdims=True)              # (BB, T, 1)
        yh = jnp.einsum('bqk,bkd->bqd', p.astype(cdt), vh,
                        preferred_element_type=jnp.float32)     # (BB, T, hd)
        # Deferred softmax normalization on the small (BB,T,hd) output; EUP recip.
        yh = yh * pl.reciprocal(denom, approx=True)

        # Fold this head's slice of c_proj (pre-split as (H, hd, C)): equivalent
        # to concat(heads) @ W_proj without the concatenate.
        attn_out = attn_out + jnp.dot(yh.reshape(R, hd).astype(cdt), wproj_ref[hh],
                                      preferred_element_type=jnp.float32)
    x = x + attn_out + bproj_ref[0]                     # residual 1

    # ---------------- MLP branch ----------------
    h2 = _layernorm(x, ln2_g_ref[0], ln2_b_ref[0]).astype(cdt)
    f = jnp.dot(h2, wfc_ref[...], preferred_element_type=jnp.float32) + bfc_ref[0]
    f = _gelu_exact(f).astype(cdt)
    m = jnp.dot(f, wmp_ref[...], preferred_element_type=jnp.float32) + bmp_ref[0]
    out_ref[...] = (x + m).reshape(BB, T, C).astype(out_ref.dtype)   # residual 2


def _prepare_kernel_params(params, n_head, compute_dtype):
    """Wrapper-side layout plumbing: per-head weight slices (so the kernel never
    lane-slices activations), softmax scale folded into wq/bq, proj pre-split per
    head, MXU weight operands cast to bf16.  Biases / LayerNorm params stay f32."""
    C = params['ln1_g'].shape[-1]
    hd = C // n_head
    cd = compute_dtype
    scale = 1.0 / math.sqrt(hd)

    w_attn, b_attn = params['w_attn'], params['b_attn']          # (C,3C), (1,3C)
    wq, wk, wv = w_attn[:, :C], w_attn[:, C:2 * C], w_attn[:, 2 * C:]
    bq, bk, bv = b_attn[0, :C], b_attn[0, C:2 * C], b_attn[0, 2 * C:]

    # (C, C) -> (H, C, hd); column h*hd+d of q corresponds to head h, dim d.
    def per_head(w):
        return w.reshape(C, n_head, hd).transpose(1, 0, 2)

    wq_h = (per_head(wq) * scale).astype(cd)
    wk_h = per_head(wk).astype(cd)
    wv_h = per_head(wv).astype(cd)
    bq_h = (bq * scale).reshape(n_head, hd)
    bk_h = bk.reshape(n_head, hd)
    bv_h = bv.reshape(n_head, hd)
    wproj_h = params['w_proj'].reshape(n_head, hd, C).astype(cd)  # head-major rows

    return [
        params['ln1_g'], params['ln1_b'],
        wq_h, bq_h, wk_h, bk_h, wv_h, bv_h,
        wproj_h, params['b_proj'],
        params['ln2_g'], params['ln2_b'],
        params['w_fc'].astype(cd), params['b_fc'],
        params['w_mp'].astype(cd), params['b_mp'],
    ]


def gpt_block(x, params, *, seqs_per_step=SEQS_PER_STEP,
              compute_dtype=COMPUTE_DTYPE):
    B, T, C = x.shape
    hd = C // N_HEAD

    # Adapt the per-step sequence count to the real batch:
    #  - small B is not padded up to 32 sequences (B=2 -> one 2-sequence step),
    #  - large B splits into balanced steps of <= seqs_per_step sequences,
    #    giving grid >= 2 so v7x's two TensorCores both get work.
    n_steps = max(1, -(-B // seqs_per_step))      # cdiv
    bb = -(-B // n_steps)                          # balanced sequences per step
    B_pad = bb * n_steps
    if B_pad != B:
        x = jnp.pad(x, ((0, B_pad - B), (0, 0), (0, 0)))
    R = bb * T

    param_list = _prepare_kernel_params(params, N_HEAD, compute_dtype)
    # Additive causal mask bias, built once on host; VMEM-resident in the kernel.
    mask_bias = jnp.where(jnp.tril(jnp.ones((T, T), dtype=bool)),
                          0.0, NEG_BIAS).astype(jnp.float32)
    param_list.append(mask_bias)

    in_specs = [pl.BlockSpec((bb, T, C), lambda i: (i, 0, 0))]
    for p in param_list:
        # Constant block indices: params are DMA'd once and stay VMEM-resident.
        in_specs.append(pl.BlockSpec(p.shape, lambda i, _r=p.ndim: (0,) * _r))

    grid = (n_steps,)

    # Advisory cost estimate so XLA schedules the custom call sensibly.
    flops_step = (3 * 2 * R * C * C                       # qkv projections
                  + N_HEAD * 2 * 2 * bb * T * T * hd      # batched q@k^T and p@v
                  + 2 * R * C * C                         # output projection
                  + 2 * R * C * 4 * C + 2 * R * 4 * C * C)  # MLP
    trans_step = N_HEAD * bb * T * T + R * 4 * C + 2 * R + N_HEAD * bb * T
    bytes_accessed = 2 * int(B_pad * T * C) * 4 + sum(
        int(p.size) * p.dtype.itemsize for p in param_list)

    kernel = functools.partial(block_kernel, n_head=N_HEAD,
                               compute_dtype=compute_dtype)

    out = pl.pallas_call(
        kernel,
        out_shape=jax.ShapeDtypeStruct((B_pad, T, C), x.dtype),
        grid=grid,
        in_specs=in_specs,
        out_specs=pl.BlockSpec((bb, T, C), lambda i: (i, 0, 0)),
        compiler_params=pltpu.CompilerParams(dimension_semantics=("parallel",)),
        cost_estimate=pl.CostEstimate(
            flops=grid[0] * flops_step,
            transcendentals=grid[0] * trans_step,
            bytes_accessed=bytes_accessed),
    )(x, *param_list)
    return out[:B]


def init_params(key, n_embd):
    ks = jax.random.split(key, 4)
    std = 0.02
    f32 = jnp.float32
    return {
        # LayerNorm 1
        'ln1_g': jnp.ones((1, n_embd), f32),
        'ln1_b': jnp.zeros((1, n_embd), f32),
        # c_attn: Linear(C, 3C); stored as (C, 3C) so y = x @ W + b
        'w_attn': std * jax.random.normal(ks[0], (n_embd, 3 * n_embd), f32),
        'b_attn': jnp.zeros((1, 3 * n_embd), f32),
        # c_proj (attention): Linear(C, C)
        'w_proj': std * jax.random.normal(ks[1], (n_embd, n_embd), f32),
        'b_proj': jnp.zeros((1, n_embd), f32),
        # LayerNorm 2
        'ln2_g': jnp.ones((1, n_embd), f32),
        'ln2_b': jnp.zeros((1, n_embd), f32),
        # MLP c_fc: Linear(C, 4C)
        'w_fc': std * jax.random.normal(ks[2], (n_embd, 4 * n_embd), f32),
        'b_fc': jnp.zeros((1, 4 * n_embd), f32),
        # MLP c_proj: Linear(4C, C)
        'w_mp': std * jax.random.normal(ks[3], (4 * n_embd, n_embd), f32),
        'b_mp': jnp.zeros((1, n_embd), f32),
    }


def reference_block(x, p):
    """Pure-JAX f32 reference with the PyTorch module's semantics."""
    B, T, C = x.shape
    hd = C // N_HEAD

    def ln(v, g, b):
        mu = jnp.mean(v, -1, keepdims=True)
        var = jnp.mean((v - mu) ** 2, -1, keepdims=True)
        return (v - mu) / jnp.sqrt(var + EPS) * g + b

    h = ln(x, p['ln1_g'][0], p['ln1_b'][0])
    qkv = h @ p['w_attn'] + p['b_attn'][0]
    q, k, v = jnp.split(qkv, 3, axis=-1)
    q = q.reshape(B, T, N_HEAD, hd).transpose(0, 2, 1, 3)
    k = k.reshape(B, T, N_HEAD, hd).transpose(0, 2, 1, 3)
    v = v.reshape(B, T, N_HEAD, hd).transpose(0, 2, 1, 3)
    att = (q @ k.transpose(0, 1, 3, 2)) / math.sqrt(hd)
    mask = jnp.tril(jnp.ones((T, T), bool))
    att = jnp.where(mask, att, -jnp.inf)
    att = jax.nn.softmax(att, axis=-1)
    y = (att @ v).transpose(0, 2, 1, 3).reshape(B, T, C)
    y = y @ p['w_proj'] + p['b_proj'][0]
    x = x + y
    h2 = ln(x, p['ln2_g'][0], p['ln2_b'][0])
    f = h2 @ p['w_fc'] + p['b_fc'][0]
    f = 0.5 * f * (1.0 + lax.erf(f / math.sqrt(2.0)))
    m = f @ p['w_mp'] + p['b_mp'][0]
    return x + m


if __name__ == "__main__":
    B, T, C = 2, BLOCK_SIZE, N_EMBD
    key = jax.random.PRNGKey(0)
    kx, kp, kx2 = jax.random.split(key, 3)
    x = jax.random.normal(kx, (B, T, C), jnp.float32)
    params = init_params(kp, C)

    # Primary small case (no padding to 32 sequences on the small-batch path).
    out = jax.block_until_ready(gpt_block(x, params))
    ref = reference_block(x, params)
    assert out.shape == (B, T, C)
    err = float(jnp.max(jnp.abs(out - ref)))
    # bf16 MXU operands (f32 accumulate) + approx reciprocal -> loose tolerance.
    assert jnp.allclose(out, ref, atol=2e-2, rtol=2e-2), err

    # Exercise the multi-grid-step path (2 steps of 32 sequences each).
    x2 = jax.random.normal(kx2, (64, T, C), jnp.float32)
    out2 = jax.block_until_ready(gpt_block(x2, params))
    ref2 = reference_block(x2, params)
    err2 = float(jnp.max(jnp.abs(out2 - ref2)))
    assert jnp.allclose(out2, ref2, atol=2e-2, rtol=2e-2), err2

    print("KERNEL_OK")
</pallas_src>

<mosaic_0001>
module attributes {stable_mosaic.version = 11 : i64} {
  func.func @block_kernel(%arg0: i32, %arg1: memref<2x8x32xf32, #tpu.memory_space<vmem>>, %arg2: memref<1x32xf32, #tpu.memory_space<vmem>>, %arg3: memref<1x32xf32, #tpu.memory_space<vmem>>, %arg4: memref<4x32x8xbf16, #tpu.memory_space<vmem>>, %arg5: memref<4x8xf32, #tpu.memory_space<vmem>>, %arg6: memref<4x32x8xbf16, #tpu.memory_space<vmem>>, %arg7: memref<4x8xf32, #tpu.memory_space<vmem>>, %arg8: memref<4x32x8xbf16, #tpu.memory_space<vmem>>, %arg9: memref<4x8xf32, #tpu.memory_space<vmem>>, %arg10: memref<4x8x32xbf16, #tpu.memory_space<vmem>>, %arg11: memref<1x32xf32, #tpu.memory_space<vmem>>, %arg12: memref<1x32xf32, #tpu.memory_space<vmem>>, %arg13: memref<1x32xf32, #tpu.memory_space<vmem>>, %arg14: memref<32x128xbf16, #tpu.memory_space<vmem>>, %arg15: memref<1x128xf32, #tpu.memory_space<vmem>>, %arg16: memref<128x32xbf16, #tpu.memory_space<vmem>>, %arg17: memref<1x32xf32, #tpu.memory_space<vmem>>, %arg18: memref<8x8xf32, #tpu.memory_space<vmem>>, %arg19: memref<2x8x32xf32, #tpu.memory_space<vmem>>) attributes {dimension_semantics = [#tpu.dimension_semantics<parallel>], iteration_bounds = array<i64: 1>, scalar_prefetch = 0 : i64, scratch_operands = 0 : i64, tpu.core_type = #tpu.core_type<tc>, window_params = [{transform_indices = @transform_0, window_bounds = array<i64: 2, 8, 32>}, {pipeline_mode = #tpu.pipeline_mode<synchronous>, transform_indices = @transform_1, window_bounds = array<i64: 1, 32>}, {pipeline_mode = #tpu.pipeline_mode<synchronous>, transform_indices = @transform_2, window_bounds = array<i64: 1, 32>}, {pipeline_mode = #tpu.pipeline_mode<synchronous>, transform_indices = @transform_3, window_bounds = array<i64: 4, 32, 8>}, {pipeline_mode = #tpu.pipeline_mode<synchronous>, transform_indices = @transform_4, window_bounds = array<i64: 4, 8>}, {pipeline_mode = #tpu.pipeline_mode<synchronous>, transform_indices = @transform_5, window_bounds = array<i64: 4, 32, 8>}, {pipeline_mode = #tpu.pipeline_mode<synchronous>, transform_indices = @transform_6, window_bounds = array<i64: 4, 8>}, {pipeline_mode = #tpu.pipeline_mode<synchronous>, transform_indices = @transform_7, window_bounds = array<i64: 4, 32, 8>}, {pipeline_mode = #tpu.pipeline_mode<synchronous>, transform_indices = @transform_8, window_bounds = array<i64: 4, 8>}, {pipeline_mode = #tpu.pipeline_mode<synchronous>, transform_indices = @transform_9, window_bounds = array<i64: 4, 8, 32>}, {pipeline_mode = #tpu.pipeline_mode<synchronous>, transform_indices = @transform_10, window_bounds = array<i64: 1, 32>}, {pipeline_mode = #tpu.pipeline_mode<synchronous>, transform_indices = @transform_11, window_bounds = array<i64: 1, 32>}, {pipeline_mode = #tpu.pipeline_mode<synchronous>, transform_indices = @transform_12, window_bounds = array<i64: 1, 32>}, {pipeline_mode = #tpu.pipeline_mode<synchronous>, transform_indices = @transform_13, window_bounds = array<i64: 32, 128>}, {pipeline_mode = #tpu.pipeline_mode<synchronous>, transform_indices = @transform_14, window_bounds = array<i64: 1, 128>}, {pipeline_mode = #tpu.pipeline_mode<synchronous>, transform_indices = @transform_15, window_bounds = array<i64: 128, 32>}, {pipeline_mode = #tpu.pipeline_mode<synchronous>, transform_indices = @transform_16, window_bounds = array<i64: 1, 32>}, {pipeline_mode = #tpu.pipeline_mode<synchronous>, transform_indices = @transform_17, window_bounds = array<i64: 8, 8>}, {transform_indices = @transform_18, window_bounds = array<i64: 2, 8, 32>}]} {
    %c0 = arith.constant 0 : index
    %c0_0 = arith.constant 0 : index
    %c0_1 = arith.constant 0 : index
    %0 = vector.load %arg1[%c0, %c0_0, %c0_1] : memref<2x8x32xf32, #tpu.memory_space<vmem>>, vector<2x8x32xf32>
    %1 = vector.shape_cast %0 : vector<2x8x32xf32> to vector<16x32xf32>
    %c0_2 = arith.constant 0 : index
    %c0_3 = arith.constant 0 : index
    %2 = vector.load %arg2[%c0_2, %c0_3] : memref<1x32xf32, #tpu.memory_space<vmem>>, vector<1x32xf32>
    %3 = vector.shape_cast %2 : vector<1x32xf32> to vector<32xf32>
    %c0_4 = arith.constant 0 : index
    %c0_5 = arith.constant 0 : index
    %4 = vector.load %arg3[%c0_4, %c0_5] : memref<1x32xf32, #tpu.memory_space<vmem>>, vector<1x32xf32>
    %5 = vector.shape_cast %4 : vector<1x32xf32> to vector<32xf32>
    %cst = arith.constant dense<0.000000e+00> : vector<16xf32>
    %6 = vector.multi_reduction <add>, %1, %cst [1] : vector<16x32xf32> to vector<16xf32>
    %7 = vector.shape_cast %6 : vector<16xf32> to vector<16x1xf32>
    %cst_6 = arith.constant 3.200000e+01 : f32
    %8 = vector.broadcast %cst_6 : f32 to vector<16x1xf32>
    %9 = arith.divf %7, %8 : vector<16x1xf32>
    %10 = vector.broadcast %9 : vector<16x1xf32> to vector<16x32xf32>
    %11 = arith.subf %1, %10 : vector<16x32xf32>
    %12 = arith.mulf %11, %11 : vector<16x32xf32>
    %cst_7 = arith.constant dense<0.000000e+00> : vector<16xf32>
    %13 = vector.multi_reduction <add>, %12, %cst_7 [1] : vector<16x32xf32> to vector<16xf32>
    %14 = vector.shape_cast %13 : vector<16xf32> to vector<16x1xf32>
    %cst_8 = arith.constant 3.200000e+01 : f32
    %15 = vector.broadcast %cst_8 : f32 to vector<16x1xf32>
    %16 = arith.divf %14, %15 : vector<16x1xf32>
    %17 = vector.broadcast %9 : vector<16x1xf32> to vector<16x32xf32>
    %18 = arith.subf %1, %17 : vector<16x32xf32>
    %cst_9 = arith.constant 9.99999974E-6 : f32
    %19 = vector.broadcast %cst_9 : f32 to vector<16x1xf32>
    %20 = arith.addf %16, %19 : vector<16x1xf32>
    %21 = math.rsqrt %20 : vector<16x1xf32>
    %22 = vector.broadcast %21 : vector<16x1xf32> to vector<16x32xf32>
    %23 = arith.mulf %18, %22 : vector<16x32xf32>
    %24 = vector.shape_cast %3 : vector<32xf32> to vector<1x32xf32>
    %25 = vector.broadcast %24 : vector<1x32xf32> to vector<16x32xf32>
    %26 = arith.mulf %23, %25 : vector<16x32xf32>
    %27 = vector.shape_cast %5 : vector<32xf32> to vector<1x32xf32>
    %28 = vector.broadcast %27 : vector<1x32xf32> to vector<16x32xf32>
    %29 = arith.addf %26, %28 : vector<16x32xf32>
    %30 = arith.truncf %29 : vector<16x32xf32> to vector<16x32xbf16>
    %c0_10 = arith.constant 0 : index
    %c0_11 = arith.constant 0 : index
    %31 = vector.load %arg18[%c0_10, %c0_11] : memref<8x8xf32, #tpu.memory_space<vmem>>, vector<8x8xf32>
    %32 = vector.shape_cast %31 : vector<8x8xf32> to vector<1x8x8xf32>
    %33 = vector.broadcast %32 : vector<1x8x8xf32> to vector<2x8x8xf32>
    %cst_12 = arith.constant 0.000000e+00 : f32
    %34 = vector.broadcast %cst_12 : f32 to vector<16x32xf32>
    %c0_13 = arith.constant 0 : index
    %c0_14 = arith.constant 0 : index
    %c0_15 = arith.constant 0 : index
    %35 = vector.load %arg4[%c0_13, %c0_14, %c0_15] : memref<4x32x8xbf16, #tpu.memory_space<vmem>>, vector<1x32x8xbf16>
    %36 = vector.shape_cast %35 : vector<1x32x8xbf16> to vector<32x8xbf16>
    %cst_16 = arith.constant dense<0.000000e+00> : vector<16x8xf32>
    %37 = tpu.matmul %30, %36, %cst_16 {dimension_numbers = #tpu.dot_dimension_numbers<[1], [0], [0], [1], [0, 0, 1, 1], [], []>} : vector<16x32xbf16>, vector<32x8xbf16>, vector<16x8xf32> -> vector<16x8xf32>
    %c0_17 = arith.constant 0 : index
    %c0_18 = arith.constant 0 : index
    %38 = vector.load %arg5[%c0_17, %c0_18] : memref<4x8xf32, #tpu.memory_space<vmem>>, vector<1x8xf32>
    %39 = vector.shape_cast %38 : vector<1x8xf32> to vector<8xf32>
    %40 = vector.shape_cast %39 : vector<8xf32> to vector<1x8xf32>
    %41 = vector.broadcast %40 : vector<1x8xf32> to vector<16x8xf32>
    %42 = arith.addf %37, %41 : vector<16x8xf32>
    %c0_19 = arith.constant 0 : index
    %c0_20 = arith.constant 0 : index
    %c0_21 = arith.constant 0 : index
    %43 = vector.load %arg6[%c0_19, %c0_20, %c0_21] : memref<4x32x8xbf16, #tpu.memory_space<vmem>>, vector<1x32x8xbf16>
    %44 = vector.shape_cast %43 : vector<1x32x8xbf16> to vector<32x8xbf16>
    %cst_22 = arith.constant dense<0.000000e+00> : vector<16x8xf32>
    %45 = tpu.matmul %30, %44, %cst_22 {dimension_numbers = #tpu.dot_dimension_numbers<[1], [0], [0], [1], [0, 0, 1, 1], [], []>} : vector<16x32xbf16>, vector<32x8xbf16>, vector<16x8xf32> -> vector<16x8xf32>
    %c0_23 = arith.constant 0 : index
    %c0_24 = arith.constant 0 : index
    %46 = vector.load %arg7[%c0_23, %c0_24] : memref<4x8xf32, #tpu.memory_space<vmem>>, vector<1x8xf32>
    %47 = vector.shape_cast %46 : vector<1x8xf32> to vector<8xf32>
    %48 = vector.shape_cast %47 : vector<8xf32> to vector<1x8xf32>
    %49 = vector.broadcast %48 : vector<1x8xf32> to vector<16x8xf32>
    %50 = arith.addf %45, %49 : vector<16x8xf32>
    %c0_25 = arith.constant 0 : index
    %c0_26 = arith.constant 0 : index
    %c0_27 = arith.constant 0 : index
    %51 = vector.load %arg8[%c0_25, %c0_26, %c0_27] : memref<4x32x8xbf16, #tpu.memory_space<vmem>>, vector<1x32x8xbf16>
    %52 = vector.shape_cast %51 : vector<1x32x8xbf16> to vector<32x8xbf16>
    %cst_28 = arith.constant dense<0.000000e+00> : vector<16x8xf32>
    %53 = tpu.matmul %30, %52, %cst_28 {dimension_numbers = #tpu.dot_dimension_numbers<[1], [0], [0], [1], [0, 0, 1, 1], [], []>} : vector<16x32xbf16>, vector<32x8xbf16>, vector<16x8xf32> -> vector<16x8xf32>
    %c0_29 = arith.constant 0 : index
    %c0_30 = arith.constant 0 : index
    %54 = vector.load %arg9[%c0_29, %c0_30] : memref<4x8xf32, #tpu.memory_space<vmem>>, vector<1x8xf32>
    %55 = vector.shape_cast %54 : vector<1x8xf32> to vector<8xf32>
    %56 = vector.shape_cast %55 : vector<8xf32> to vector<1x8xf32>
    %57 = vector.broadcast %56 : vector<1x8xf32> to vector<16x8xf32>
    %58 = arith.addf %53, %57 : vector<16x8xf32>
    %59 = arith.truncf %42 : vector<16x8xf32> to vector<16x8xbf16>
    %60 = vector.shape_cast %59 : vector<16x8xbf16> to vector<2x8x8xbf16>
    %61 = arith.truncf %50 : vector<16x8xf32> to vector<16x8xbf16>
    %62 = vector.shape_cast %61 : vector<16x8xbf16> to vector<2x8x8xbf16>
    %63 = arith.truncf %58 : vector<16x8xf32> to vector<16x8xbf16>
    %64 = vector.shape_cast %63 : vector<16x8xbf16> to vector<2x8x8xbf16>
    "tpu.trace_start"() <{level = 10 : i32, message = "bqd,bkd->bqk"}> : () -> ()
    %cst_31 = arith.constant dense<0.000000e+00> : vector<2x8x8xf32>
    %65 = tpu.matmul %60, %62, %cst_31 {dimension_numbers = #tpu.dot_dimension_numbers<[2], [2], [1], [1], [0, 0, 0, 1, 1, 1], [0], [0]>} : vector<2x8x8xbf16>, vector<2x8x8xbf16>, vector<2x8x8xf32> -> vector<2x8x8xf32>
    "tpu.trace_stop"() : () -> ()
    %66 = arith.addf %65, %33 : vector<2x8x8xf32>
    %cst_32 = arith.constant dense<0xFF800000> : vector<2x8xf32>
    %67 = vector.multi_reduction <maximumf>, %66, %cst_32 [2] : vector<2x8x8xf32> to vector<2x8xf32>
    %68 = vector.shape_cast %67 : vector<2x8xf32> to vector<2x8x1xf32>
    %69 = vector.broadcast %68 : vector<2x8x1xf32> to vector<2x8x8xf32>
    %70 = arith.subf %66, %69 : vector<2x8x8xf32>
    %71 = math.exp %70 : vector<2x8x8xf32>
    %cst_33 = arith.constant dense<0.000000e+00> : vector<2x8xf32>
    %72 = vector.multi_reduction <add>, %71, %cst_33 [2] : vector<2x8x8xf32> to vector<2x8xf32>
    %73 = vector.shape_cast %72 : vector<2x8xf32> to vector<2x8x1xf32>
    %74 = arith.truncf %71 : vector<2x8x8xf32> to vector<2x8x8xbf16>
    "tpu.trace_start"() <{level = 10 : i32, message = "bqk,bkd->bqd"}> : () -> ()
    %cst_34 = arith.constant dense<0.000000e+00> : vector<2x8x8xf32>
    %75 = tpu.matmul %74, %64, %cst_34 {dimension_numbers = #tpu.dot_dimension_numbers<[2], [1], [1], [2], [0, 0, 0, 1, 1, 2], [0], [0]>} : vector<2x8x8xbf16>, vector<2x8x8xbf16>, vector<2x8x8xf32> -> vector<2x8x8xf32>
    "tpu.trace_stop"() : () -> ()
    %76 = tpu.reciprocal %73 {approx = true} : vector<2x8x1xf32> -> vector<2x8x1xf32>
    %77 = vector.broadcast %76 : vector<2x8x1xf32> to vector<2x8x8xf32>
    %78 = arith.mulf %75, %77 : vector<2x8x8xf32>
    %79 = vector.shape_cast %78 : vector<2x8x8xf32> to vector<16x8xf32>
    %80 = arith.truncf %79 : vector<16x8xf32> to vector<16x8xbf16>
    %c0_35 = arith.constant 0 : index
    %c0_36 = arith.constant 0 : index
    %c0_37 = arith.constant 0 : index
    %81 = vector.load %arg10[%c0_35, %c0_36, %c0_37] : memref<4x8x32xbf16, #tpu.memory_space<vmem>>, vector<1x8x32xbf16>
    %82 = vector.shape_cast %81 : vector<1x8x32xbf16> to vector<8x32xbf16>
    %cst_38 = arith.constant dense<0.000000e+00> : vector<16x32xf32>
    %83 = tpu.matmul %80, %82, %cst_38 {dimension_numbers = #tpu.dot_dimension_numbers<[1], [0], [0], [1], [0, 0, 1, 1], [], []>} : vector<16x8xbf16>, vector<8x32xbf16>, vector<16x32xf32> -> vector<16x32xf32>
    %84 = arith.addf %34, %83 : vector<16x32xf32>
    %c1 = arith.constant 1 : index
    %c0_39 = arith.constant 0 : index
    %c0_40 = arith.constant 0 : index
    %85 = vector.load %arg4[%c1, %c0_39, %c0_40] : memref<4x32x8xbf16, #tpu.memory_space<vmem>>, vector<1x32x8xbf16>
    %86 = vector.shape_cast %85 : vector<1x32x8xbf16> to vector<32x8xbf16>
    %cst_41 = arith.constant dense<0.000000e+00> : vector<16x8xf32>
    %87 = tpu.matmul %30, %86, %cst_41 {dimension_numbers = #tpu.dot_dimension_numbers<[1], [0], [0], [1], [0, 0, 1, 1], [], []>} : vector<16x32xbf16>, vector<32x8xbf16>, vector<16x8xf32> -> vector<16x8xf32>
    %c1_42 = arith.constant 1 : index
    %c0_43 = arith.constant 0 : index
    %88 = vector.load %arg5[%c1_42, %c0_43] : memref<4x8xf32, #tpu.memory_space<vmem>>, vector<1x8xf32>
    %89 = vector.shape_cast %88 : vector<1x8xf32> to vector<8xf32>
    %90 = vector.shape_cast %89 : vector<8xf32> to vector<1x8xf32>
    %91 = vector.broadcast %90 : vector<1x8xf32> to vector<16x8xf32>
    %92 = arith.addf %87, %91 : vector<16x8xf32>
    %c1_44 = arith.constant 1 : index
    %c0_45 = arith.constant 0 : index
    %c0_46 = arith.constant 0 : index
    %93 = vector.load %arg6[%c1_44, %c0_45, %c0_46] : memref<4x32x8xbf16, #tpu.memory_space<vmem>>, vector<1x32x8xbf16>
    %94 = vector.shape_cast %93 : vector<1x32x8xbf16> to vector<32x8xbf16>
    %cst_47 = arith.constant dense<0.000000e+00> : vector<16x8xf32>
    %95 = tpu.matmul %30, %94, %cst_47 {dimension_numbers = #tpu.dot_dimension_numbers<[1], [0], [0], [1], [0, 0, 1, 1], [], []>} : vector<16x32xbf16>, vector<32x8xbf16>, vector<16x8xf32> -> vector<16x8xf32>
    %c1_48 = arith.constant 1 : index
    %c0_49 = arith.constant 0 : index
    %96 = vector.load %arg7[%c1_48, %c0_49] : memref<4x8xf32, #tpu.memory_space<vmem>>, vector<1x8xf32>
    %97 = vector.shape_cast %96 : vector<1x8xf32> to vector<8xf32>
    %98 = vector.shape_cast %97 : vector<8xf32> to vector<1x8xf32>
    %99 = vector.broadcast %98 : vector<1x8xf32> to vector<16x8xf32>
    %100 = arith.addf %95, %99 : vector<16x8xf32>
    %c1_50 = arith.constant 1 : index
    %c0_51 = arith.constant 0 : index
    %c0_52 = arith.constant 0 : index
    %101 = vector.load %arg8[%c1_50, %c0_51, %c0_52] : memref<4x32x8xbf16, #tpu.memory_space<vmem>>, vector<1x32x8xbf16>
    %102 = vector.shape_cast %101 : vector<1x32x8xbf16> to vector<32x8xbf16>
    %cst_53 = arith.constant dense<0.000000e+00> : vector<16x8xf32>
    %103 = tpu.matmul %30, %102, %cst_53 {dimension_numbers = #tpu.dot_dimension_numbers<[1], [0], [0], [1], [0, 0, 1, 1], [], []>} : vector<16x32xbf16>, vector<32x8xbf16>, vector<16x8xf32> -> vector<16x8xf32>
    %c1_54 = arith.constant 1 : index
    %c0_55 = arith.constant 0 : index
    %104 = vector.load %arg9[%c1_54, %c0_55] : memref<4x8xf32, #tpu.memory_space<vmem>>, vector<1x8xf32>
    %105 = vector.shape_cast %104 : vector<1x8xf32> to vector<8xf32>
    %106 = vector.shape_cast %105 : vector<8xf32> to vector<1x8xf32>
    %107 = vector.broadcast %106 : vector<1x8xf32> to vector<16x8xf32>
    %108 = arith.addf %103, %107 : vector<16x8xf32>
    %109 = arith.truncf %92 : vector<16x8xf32> to vector<16x8xbf16>
    %110 = vector.shape_cast %109 : vector<16x8xbf16> to vector<2x8x8xbf16>
    %111 = arith.truncf %100 : vector<16x8xf32> to vector<16x8xbf16>
    %112 = vector.shape_cast %111 : vector<16x8xbf16> to vector<2x8x8xbf16>
    %113 = arith.truncf %108 : vector<16x8xf32> to vector<16x8xbf16>
    %114 = vector.shape_cast %113 : vector<16x8xbf16> to vector<2x8x8xbf16>
    "tpu.trace_start"() <{level = 10 : i32, message = "bqd,bkd->bqk"}> : () -> ()
    %cst_56 = arith.constant dense<0.000000e+00> : vector<2x8x8xf32>
    %115 = tpu.matmul %110, %112, %cst_56 {dimension_numbers = #tpu.dot_dimension_numbers<[2], [2], [1], [1], [0, 0, 0, 1, 1, 1], [0], [0]>} : vector<2x8x8xbf16>, vector<2x8x8xbf16>, vector<2x8x8xf32> -> vector<2x8x8xf32>
    "tpu.trace_stop"() : () -> ()
    %116 = arith.addf %115, %33 : vector<2x8x8xf32>
    %cst_57 = arith.constant dense<0xFF800000> : vector<2x8xf32>
    %117 = vector.multi_reduction <maximumf>, %116, %cst_57 [2] : vector<2x8x8xf32> to vector<2x8xf32>
    %118 = vector.shape_cast %117 : vector<2x8xf32> to vector<2x8x1xf32>
    %119 = vector.broadcast %118 : vector<2x8x1xf32> to vector<2x8x8xf32>
    %120 = arith.subf %116, %119 : vector<2x8x8xf32>
    %121 = math.exp %120 : vector<2x8x8xf32>
    %cst_58 = arith.constant dense<0.000000e+00> : vector<2x8xf32>
    %122 = vector.multi_reduction <add>, %121, %cst_58 [2] : vector<2x8x8xf32> to vector<2x8xf32>
    %123 = vector.shape_cast %122 : vector<2x8xf32> to vector<2x8x1xf32>
    %124 = arith.truncf %121 : vector<2x8x8xf32> to vector<2x8x8xbf16>
    "tpu.trace_start"() <{level = 10 : i32, message = "bqk,bkd->bqd"}> : () -> ()
    %cst_59 = arith.constant dense<0.000000e+00> : vector<2x8x8xf32>
    %125 = tpu.matmul %124, %114, %cst_59 {dimension_numbers = #tpu.dot_dimension_numbers<[2], [1], [1], [2], [0, 0, 0, 1, 1, 2], [0], [0]>} : vector<2x8x8xbf16>, vector<2x8x8xbf16>, vector<2x8x8xf32> -> vector<2x8x8xf32>
    "tpu.trace_stop"() : () -> ()
    %126 = tpu.reciprocal %123 {approx = true} : vector<2x8x1xf32> -> vector<2x8x1xf32>
    %127 = vector.broadcast %126 : vector<2x8x1xf32> to vector<2x8x8xf32>
    %128 = arith.mulf %125, %127 : vector<2x8x8xf32>
    %129 = vector.shape_cast %128 : vector<2x8x8xf32> to vector<16x8xf32>
    %130 = arith.truncf %129 : vector<16x8xf32> to vector<16x8xbf16>
    %c1_60 = arith.constant 1 : index
    %c0_61 = arith.constant 0 : index
    %c0_62 = arith.constant 0 : index
    %131 = vector.load %arg10[%c1_60, %c0_61, %c0_62] : memref<4x8x32xbf16, #tpu.memory_space<vmem>>, vector<1x8x32xbf16>
    %132 = vector.shape_cast %131 : vector<1x8x32xbf16> to vector<8x32xbf16>
    %cst_63 = arith.constant dense<0.000000e+00> : vector<16x32xf32>
    %133 = tpu.matmul %130, %132, %cst_63 {dimension_numbers = #tpu.dot_dimension_numbers<[1], [0], [0], [1], [0, 0, 1, 1], [], []>} : vector<16x8xbf16>, vector<8x32xbf16>, vector<16x32xf32> -> vector<16x32xf32>
    %134 = arith.addf %84, %133 : vector<16x32xf32>
    %c2 = arith.constant 2 : index
    %c0_64 = arith.constant 0 : index
    %c0_65 = arith.constant 0 : index
    %135 = vector.load %arg4[%c2, %c0_64, %c0_65] : memref<4x32x8xbf16, #tpu.memory_space<vmem>>, vector<1x32x8xbf16>
    %136 = vector.shape_cast %135 : vector<1x32x8xbf16> to vector<32x8xbf16>
    %cst_66 = arith.constant dense<0.000000e+00> : vector<16x8xf32>
    %137 = tpu.matmul %30, %136, %cst_66 {dimension_numbers = #tpu.dot_dimension_numbers<[1], [0], [0], [1], [0, 0, 1, 1], [], []>} : vector<16x32xbf16>, vector<32x8xbf16>, vector<16x8xf32> -> vector<16x8xf32>
    %c2_67 = arith.constant 2 : index
    %c0_68 = arith.constant 0 : index
    %138 = vector.load %arg5[%c2_67, %c0_68] : memref<4x8xf32, #tpu.memory_space<vmem>>, vector<1x8xf32>
    %139 = vector.shape_cast %138 : vector<1x8xf32> to vector<8xf32>
    %140 = vector.shape_cast %139 : vector<8xf32> to vector<1x8xf32>
    %141 = vector.broadcast %140 : vector<1x8xf32> to vector<16x8xf32>
    %142 = arith.addf %137, %141 : vector<16x8xf32>
    %c2_69 = arith.constant 2 : index
    %c0_70 = arith.constant 0 : index
    %c0_71 = arith.constant 0 : index
    %143 = vector.load %arg6[%c2_69, %c0_70, %c0_71] : memref<4x32x8xbf16, #tpu.memory_space<vmem>>, vector<1x32x8xbf16>
    %144 = vector.shape_cast %143 : vector<1x32x8xbf16> to vector<32x8xbf16>
    %cst_72 = arith.constant dense<0.000000e+00> : vector<16x8xf32>
    %145 = tpu.matmul %30, %144, %cst_72 {dimension_numbers = #tpu.dot_dimension_numbers<[1], [0], [0], [1], [0, 0, 1, 1], [], []>} : vector<16x32xbf16>, vector<32x8xbf16>, vector<16x8xf32> -> vector<16x8xf32>
    %c2_73 = arith.constant 2 : index
    %c0_74 = arith.constant 0 : index
    %146 = vector.load %arg7[%c2_73, %c0_74] : memref<4x8xf32, #tpu.memory_space<vmem>>, vector<1x8xf32>
    %147 = vector.shape_cast %146 : vector<1x8xf32> to vector<8xf32>
    %148 = vector.shape_cast %147 : vector<8xf32> to vector<1x8xf32>
    %149 = vector.broadcast %148 : vector<1x8xf32> to vector<16x8xf32>
    %150 = arith.addf %145, %149 : vector<16x8xf32>
    %c2_75 = arith.constant 2 : index
    %c0_76 = arith.constant 0 : index
    %c0_77 = arith.constant 0 : index
    %151 = vector.load %arg8[%c2_75, %c0_76, %c0_77] : memref<4x32x8xbf16, #tpu.memory_space<vmem>>, vector<1x32x8xbf16>
    %152 = vector.shape_cast %151 : vector<1x32x8xbf16> to vector<32x8xbf16>
    %cst_78 = arith.constant dense<0.000000e+00> : vector<16x8xf32>
    %153 = tpu.matmul %30, %152, %cst_78 {dimension_numbers = #tpu.dot_dimension_numbers<[1], [0], [0], [1], [0, 0, 1, 1], [], []>} : vector<16x32xbf16>, vector<32x8xbf16>, vector<16x8xf32> -> vector<16x8xf32>
    %c2_79 = arith.constant 2 : index
    %c0_80 = arith.constant 0 : index
    %154 = vector.load %arg9[%c2_79, %c0_80] : memref<4x8xf32, #tpu.memory_space<vmem>>, vector<1x8xf32>
    %155 = vector.shape_cast %154 : vector<1x8xf32> to vector<8xf32>
    %156 = vector.shape_cast %155 : vector<8xf32> to vector<1x8xf32>
    %157 = vector.broadcast %156 : vector<1x8xf32> to vector<16x8xf32>
    %158 = arith.addf %153, %157 : vector<16x8xf32>
    %159 = arith.truncf %142 : vector<16x8xf32> to vector<16x8xbf16>
    %160 = vector.shape_cast %159 : vector<16x8xbf16> to vector<2x8x8xbf16>
    %161 = arith.truncf %150 : vector<16x8xf32> to vector<16x8xbf16>
    %162 = vector.shape_cast %161 : vector<16x8xbf16> to vector<2x8x8xbf16>
    %163 = arith.truncf %158 : vector<16x8xf32> to vector<16x8xbf16>
    %164 = vector.shape_cast %163 : vector<16x8xbf16> to vector<2x8x8xbf16>
    "tpu.trace_start"() <{level = 10 : i32, message = "bqd,bkd->bqk"}> : () -> ()
    %cst_81 = arith.constant dense<0.000000e+00> : vector<2x8x8xf32>
    %165 = tpu.matmul %160, %162, %cst_81 {dimension_numbers = #tpu.dot_dimension_numbers<[2], [2], [1], [1], [0, 0, 0, 1, 1, 1], [0], [0]>} : vector<2x8x8xbf16>, vector<2x8x8xbf16>, vector<2x8x8xf32> -> vector<2x8x8xf32>
    "tpu.trace_stop"() : () -> ()
    %166 = arith.addf %165, %33 : vector<2x8x8xf32>
    %cst_82 = arith.constant dense<0xFF800000> : vector<2x8xf32>
    %167 = vector.multi_reduction <maximumf>, %166, %cst_82 [2] : vector<2x8x8xf32> to vector<2x8xf32>
    %168 = vector.shape_cast %167 : vector<2x8xf32> to vector<2x8x1xf32>
    %169 = vector.broadcast %168 : vector<2x8x1xf32> to vector<2x8x8xf32>
    %170 = arith.subf %166, %169 : vector<2x8x8xf32>
    %171 = math.exp %170 : vector<2x8x8xf32>
    %cst_83 = arith.constant dense<0.000000e+00> : vector<2x8xf32>
    %172 = vector.multi_reduction <add>, %171, %cst_83 [2] : vector<2x8x8xf32> to vector<2x8xf32>
    %173 = vector.shape_cast %172 : vector<2x8xf32> to vector<2x8x1xf32>
    %174 = arith.truncf %171 : vector<2x8x8xf32> to vector<2x8x8xbf16>
    "tpu.trace_start"() <{level = 10 : i32, message = "bqk,bkd->bqd"}> : () -> ()
    %cst_84 = arith.constant dense<0.000000e+00> : vector<2x8x8xf32>
    %175 = tpu.matmul %174, %164, %cst_84 {dimension_numbers = #tpu.dot_dimension_numbers<[2], [1], [1], [2], [0, 0, 0, 1, 1, 2], [0], [0]>} : vector<2x8x8xbf16>, vector<2x8x8xbf16>, vector<2x8x8xf32> -> vector<2x8x8xf32>
    "tpu.trace_stop"() : () -> ()
    %176 = tpu.reciprocal %173 {approx = true} : vector<2x8x1xf32> -> vector<2x8x1xf32>
    %177 = vector.broadcast %176 : vector<2x8x1xf32> to vector<2x8x8xf32>
    %178 = arith.mulf %175, %177 : vector<2x8x8xf32>
    %179 = vector.shape_cast %178 : vector<2x8x8xf32> to vector<16x8xf32>
    %180 = arith.truncf %179 : vector<16x8xf32> to vector<16x8xbf16>
    %c2_85 = arith.constant 2 : index
    %c0_86 = arith.constant 0 : index
    %c0_87 = arith.constant 0 : index
    %181 = vector.load %arg10[%c2_85, %c0_86, %c0_87] : memref<4x8x32xbf16, #tpu.memory_space<vmem>>, vector<1x8x32xbf16>
    %182 = vector.shape_cast %181 : vector<1x8x32xbf16> to vector<8x32xbf16>
    %cst_88 = arith.constant dense<0.000000e+00> : vector<16x32xf32>
    %183 = tpu.matmul %180, %182, %cst_88 {dimension_numbers = #tpu.dot_dimension_numbers<[1], [0], [0], [1], [0, 0, 1, 1], [], []>} : vector<16x8xbf16>, vector<8x32xbf16>, vector<16x32xf32> -> vector<16x32xf32>
    %184 = arith.addf %134, %183 : vector<16x32xf32>
    %c3 = arith.constant 3 : index
    %c0_89 = arith.constant 0 : index
    %c0_90 = arith.constant 0 : index
    %185 = vector.load %arg4[%c3, %c0_89, %c0_90] : memref<4x32x8xbf16, #tpu.memory_space<vmem>>, vector<1x32x8xbf16>
    %186 = vector.shape_cast %185 : vector<1x32x8xbf16> to vector<32x8xbf16>
    %cst_91 = arith.constant dense<0.000000e+00> : vector<16x8xf32>
    %187 = tpu.matmul %30, %186, %cst_91 {dimension_numbers = #tpu.dot_dimension_numbers<[1], [0], [0], [1], [0, 0, 1, 1], [], []>} : vector<16x32xbf16>, vector<32x8xbf16>, vector<16x8xf32> -> vector<16x8xf32>
    %c3_92 = arith.constant 3 : index
    %c0_93 = arith.constant 0 : index
    %188 = vector.load %arg5[%c3_92, %c0_93] : memref<4x8xf32, #tpu.memory_space<vmem>>, vector<1x8xf32>
    %189 = vector.shape_cast %188 : vector<1x8xf32> to vector<8xf32>
    %190 = vector.shape_cast %189 : vector<8xf32> to vector<1x8xf32>
    %191 = vector.broadcast %190 : vector<1x8xf32> to vector<16x8xf32>
    %192 = arith.addf %187, %191 : vector<16x8xf32>
    %c3_94 = arith.constant 3 : index
    %c0_95 = arith.constant 0 : index
    %c0_96 = arith.constant 0 : index
    %193 = vector.load %arg6[%c3_94, %c0_95, %c0_96] : memref<4x32x8xbf16, #tpu.memory_space<vmem>>, vector<1x32x8xbf16>
    %194 = vector.shape_cast %193 : vector<1x32x8xbf16> to vector<32x8xbf16>
    %cst_97 = arith.constant dense<0.000000e+00> : vector<16x8xf32>
    %195 = tpu.matmul %30, %194, %cst_97 {dimension_numbers = #tpu.dot_dimension_numbers<[1], [0], [0], [1], [0, 0, 1, 1], [], []>} : vector<16x32xbf16>, vector<32x8xbf16>, vector<16x8xf32> -> vector<16x8xf32>
    %c3_98 = arith.constant 3 : index
    %c0_99 = arith.constant 0 : index
    %196 = vector.load %arg7[%c3_98, %c0_99] : memref<4x8xf32, #tpu.memory_space<vmem>>, vector<1x8xf32>
    %197 = vector.shape_cast %196 : vector<1x8xf32> to vector<8xf32>
    %198 = vector.shape_cast %197 : vector<8xf32> to vector<1x8xf32>
    %199 = vector.broadcast %198 : vector<1x8xf32> to vector<16x8xf32>
    %200 = arith.addf %195, %199 : vector<16x8xf32>
    %c3_100 = arith.constant 3 : index
    %c0_101 = arith.constant 0 : index
    %c0_102 = arith.constant 0 : index
    %201 = vector.load %arg8[%c3_100, %c0_101, %c0_102] : memref<4x32x8xbf16, #tpu.memory_space<vmem>>, vector<1x32x8xbf16>
    %202 = vector.shape_cast %201 : vector<1x32x8xbf16> to vector<32x8xbf16>
    %cst_103 = arith.constant dense<0.000000e+00> : vector<16x8xf32>
    %203 = tpu.matmul %30, %202, %cst_103 {dimension_numbers = #tpu.dot_dimension_numbers<[1], [0], [0], [1], [0, 0, 1, 1], [], []>} : vector<16x32xbf16>, vector<32x8xbf16>, vector<16x8xf32> -> vector<16x8xf32>
    %c3_104 = arith.constant 3 : index
    %c0_105 = arith.constant 0 : index
    %204 = vector.load %arg9[%c3_104, %c0_105] : memref<4x8xf32, #tpu.memory_space<vmem>>, vector<1x8xf32>
    %205 = vector.shape_cast %204 : vector<1x8xf32> to vector<8xf32>
    %206 = vector.shape_cast %205 : vector<8xf32> to vector<1x8xf32>
    %207 = vector.broadcast %206 : vector<1x8xf32> to vector<16x8xf32>
    %208 = arith.addf %203, %207 : vector<16x8xf32>
    %209 = arith.truncf %192 : vector<16x8xf32> to vector<16x8xbf16>
    %210 = vector.shape_cast %209 : vector<16x8xbf16> to vector<2x8x8xbf16>
    %211 = arith.truncf %200 : vector<16x8xf32> to vector<16x8xbf16>
    %212 = vector.shape_cast %211 : vector<16x8xbf16> to vector<2x8x8xbf16>
    %213 = arith.truncf %208 : vector<16x8xf32> to vector<16x8xbf16>
    %214 = vector.shape_cast %213 : vector<16x8xbf16> to vector<2x8x8xbf16>
    "tpu.trace_start"() <{level = 10 : i32, message = "bqd,bkd->bqk"}> : () -> ()
    %cst_106 = arith.constant dense<0.000000e+00> : vector<2x8x8xf32>
    %215 = tpu.matmul %210, %212, %cst_106 {dimension_numbers = #tpu.dot_dimension_numbers<[2], [2], [1], [1], [0, 0, 0, 1, 1, 1], [0], [0]>} : vector<2x8x8xbf16>, vector<2x8x8xbf16>, vector<2x8x8xf32> -> vector<2x8x8xf32>
    "tpu.trace_stop"() : () -> ()
    %216 = arith.addf %215, %33 : vector<2x8x8xf32>
    %cst_107 = arith.constant dense<0xFF800000> : vector<2x8xf32>
    %217 = vector.multi_reduction <maximumf>, %216, %cst_107 [2] : vector<2x8x8xf32> to vector<2x8xf32>
    %218 = vector.shape_cast %217 : vector<2x8xf32> to vector<2x8x1xf32>
    %219 = vector.broadcast %218 : vector<2x8x1xf32> to vector<2x8x8xf32>
    %220 = arith.subf %216, %219 : vector<2x8x8xf32>
    %221 = math.exp %220 : vector<2x8x8xf32>
    %cst_108 = arith.constant dense<0.000000e+00> : vector<2x8xf32>
    %222 = vector.multi_reduction <add>, %221, %cst_108 [2] : vector<2x8x8xf32> to vector<2x8xf32>
    %223 = vector.shape_cast %222 : vector<2x8xf32> to vector<2x8x1xf32>
    %224 = arith.truncf %221 : vector<2x8x8xf32> to vector<2x8x8xbf16>
    "tpu.trace_start"() <{level = 10 : i32, message = "bqk,bkd->bqd"}> : () -> ()
    %cst_109 = arith.constant dense<0.000000e+00> : vector<2x8x8xf32>
    %225 = tpu.matmul %224, %214, %cst_109 {dimension_numbers = #tpu.dot_dimension_numbers<[2], [1], [1], [2], [0, 0, 0, 1, 1, 2], [0], [0]>} : vector<2x8x8xbf16>, vector<2x8x8xbf16>, vector<2x8x8xf32> -> vector<2x8x8xf32>
    "tpu.trace_stop"() : () -> ()
    %226 = tpu.reciprocal %223 {approx = true} : vector<2x8x1xf32> -> vector<2x8x1xf32>
    %227 = vector.broadcast %226 : vector<2x8x1xf32> to vector<2x8x8xf32>
    %228 = arith.mulf %225, %227 : vector<2x8x8xf32>
    %229 = vector.shape_cast %228 : vector<2x8x8xf32> to vector<16x8xf32>
    %230 = arith.truncf %229 : vector<16x8xf32> to vector<16x8xbf16>
    %c3_110 = arith.constant 3 : index
    %c0_111 = arith.constant 0 : index
    %c0_112 = arith.constant 0 : index
    %231 = vector.load %arg10[%c3_110, %c0_111, %c0_112] : memref<4x8x32xbf16, #tpu.memory_space<vmem>>, vector<1x8x32xbf16>
    %232 = vector.shape_cast %231 : vector<1x8x32xbf16> to vector<8x32xbf16>
    %cst_113 = arith.constant dense<0.000000e+00> : vector<16x32xf32>
    %233 = tpu.matmul %230, %232, %cst_113 {dimension_numbers = #tpu.dot_dimension_numbers<[1], [0], [0], [1], [0, 0, 1, 1], [], []>} : vector<16x8xbf16>, vector<8x32xbf16>, vector<16x32xf32> -> vector<16x32xf32>
    %234 = arith.addf %184, %233 : vector<16x32xf32>
    %235 = arith.addf %1, %234 : vector<16x32xf32>
    %c0_114 = arith.constant 0 : index
    %c0_115 = arith.constant 0 : index
    %236 = vector.load %arg11[%c0_114, %c0_115] : memref<1x32xf32, #tpu.memory_space<vmem>>, vector<1x32xf32>
    %237 = vector.shape_cast %236 : vector<1x32xf32> to vector<32xf32>
    %238 = vector.shape_cast %237 : vector<32xf32> to vector<1x32xf32>
    %239 = vector.broadcast %238 : vector<1x32xf32> to vector<16x32xf32>
    %240 = arith.addf %235, %239 : vector<16x32xf32>
    %c0_116 = arith.constant 0 : index
    %c0_117 = arith.constant 0 : index
    %241 = vector.load %arg12[%c0_116, %c0_117] : memref<1x32xf32, #tpu.memory_space<vmem>>, vector<1x32xf32>
    %242 = vector.shape_cast %241 : vector<1x32xf32> to vector<32xf32>
    %c0_118 = arith.constant 0 : index
    %c0_119 = arith.constant 0 : index
    %243 = vector.load %arg13[%c0_118, %c0_119] : memref<1x32xf32, #tpu.memory_space<vmem>>, vector<1x32xf32>
    %244 = vector.shape_cast %243 : vector<1x32xf32> to vector<32xf32>
    %cst_120 = arith.constant dense<0.000000e+00> : vector<16xf32>
    %245 = vector.multi_reduction <add>, %240, %cst_120 [1] : vector<16x32xf32> to vector<16xf32>
    %246 = vector.shape_cast %245 : vector<16xf32> to vector<16x1xf32>
    %cst_121 = arith.constant 3.200000e+01 : f32
    %247 = vector.broadcast %cst_121 : f32 to vector<16x1xf32>
    %248 = arith.divf %246, %247 : vector<16x1xf32>
    %249 = vector.broadcast %248 : vector<16x1xf32> to vector<16x32xf32>
    %250 = arith.subf %240, %249 : vector<16x32xf32>
    %251 = arith.mulf %250, %250 : vector<16x32xf32>
    %cst_122 = arith.constant dense<0.000000e+00> : vector<16xf32>
    %252 = vector.multi_reduction <add>, %251, %cst_122 [1] : vector<16x32xf32> to vector<16xf32>
    %253 = vector.shape_cast %252 : vector<16xf32> to vector<16x1xf32>
    %cst_123 = arith.constant 3.200000e+01 : f32
    %254 = vector.broadcast %cst_123 : f32 to vector<16x1xf32>
    %255 = arith.divf %253, %254 : vector<16x1xf32>
    %256 = vector.broadcast %248 : vector<16x1xf32> to vector<16x32xf32>
    %257 = arith.subf %240, %256 : vector<16x32xf32>
    %cst_124 = arith.constant 9.99999974E-6 : f32
    %258 = vector.broadcast %cst_124 : f32 to vector<16x1xf32>
    %259 = arith.addf %255, %258 : vector<16x1xf32>
    %260 = math.rsqrt %259 : vector<16x1xf32>
    %261 = vector.broadcast %260 : vector<16x1xf32> to vector<16x32xf32>
    %262 = arith.mulf %257, %261 : vector<16x32xf32>
    %263 = vector.shape_cast %242 : vector<32xf32> to vector<1x32xf32>
    %264 = vector.broadcast %263 : vector<1x32xf32> to vector<16x32xf32>
    %265 = arith.mulf %262, %264 : vector<16x32xf32>
    %266 = vector.shape_cast %244 : vector<32xf32> to vector<1x32xf32>
    %267 = vector.broadcast %266 : vector<1x32xf32> to vector<16x32xf32>
    %268 = arith.addf %265, %267 : vector<16x32xf32>
    %269 = arith.truncf %268 : vector<16x32xf32> to vector<16x32xbf16>
    %c0_125 = arith.constant 0 : index
    %c0_126 = arith.constant 0 : index
    %270 = vector.load %arg14[%c0_125, %c0_126] : memref<32x128xbf16, #tpu.memory_space<vmem>>, vector<32x128xbf16>
    %cst_127 = arith.constant dense<0.000000e+00> : vector<16x128xf32>
    %271 = tpu.matmul %269, %270, %cst_127 {dimension_numbers = #tpu.dot_dimension_numbers<[1], [0], [0], [1], [0, 0, 1, 1], [], []>} : vector<16x32xbf16>, vector<32x128xbf16>, vector<16x128xf32> -> vector<16x128xf32>
    %c0_128 = arith.constant 0 : index
    %c0_129 = arith.constant 0 : index
    %272 = vector.load %arg15[%c0_128, %c0_129] : memref<1x128xf32, #tpu.memory_space<vmem>>, vector<1x128xf32>
    %273 = vector.shape_cast %272 : vector<1x128xf32> to vector<128xf32>
    %274 = vector.shape_cast %273 : vector<128xf32> to vector<1x128xf32>
    %275 = vector.broadcast %274 : vector<1x128xf32> to vector<16x128xf32>
    %276 = arith.addf %271, %275 : vector<16x128xf32>
    %cst_130 = arith.constant 5.000000e-01 : f32
    %277 = vector.broadcast %cst_130 : f32 to vector<16x128xf32>
    %278 = arith.mulf %277, %276 : vector<16x128xf32>
    %cst_131 = arith.constant 0.707106769 : f32
    %279 = vector.broadcast %cst_131 : f32 to vector<16x128xf32>
    %280 = arith.mulf %276, %279 : vector<16x128xf32>
    %281 = math.erf %280 : vector<16x128xf32>
    %cst_132 = arith.constant 1.000000e+00 : f32
    %282 = vector.broadcast %cst_132 : f32 to vector<16x128xf32>
    %283 = arith.addf %282, %281 : vector<16x128xf32>
    %284 = arith.mulf %278, %283 : vector<16x128xf32>
    %285 = arith.truncf %284 : vector<16x128xf32> to vector<16x128xbf16>
    %c0_133 = arith.constant 0 : index
    %c0_134 = arith.constant 0 : index
    %286 = vector.load %arg16[%c0_133, %c0_134] : memref<128x32xbf16, #tpu.memory_space<vmem>>, vector<128x32xbf16>
    %cst_135 = arith.constant dense<0.000000e+00> : vector<16x32xf32>
    %287 = tpu.matmul %285, %286, %cst_135 {dimension_numbers = #tpu.dot_dimension_numbers<[1], [0], [0], [1], [0, 0, 1, 1], [], []>} : vector<16x128xbf16>, vector<128x32xbf16>, vector<16x32xf32> -> vector<16x32xf32>
    %c0_136 = arith.constant 0 : index
    %c0_137 = arith.constant 0 : index
    %288 = vector.load %arg17[%c0_136, %c0_137] : memref<1x32xf32, #tpu.memory_space<vmem>>, vector<1x32xf32>
    %289 = vector.shape_cast %288 : vector<1x32xf32> to vector<32xf32>
    %290 = vector.shape_cast %289 : vector<32xf32> to vector<1x32xf32>
    %291 = vector.broadcast %290 : vector<1x32xf32> to vector<16x32xf32>
    %292 = arith.addf %287, %291 : vector<16x32xf32>
    %293 = arith.addf %240, %292 : vector<16x32xf32>
    %294 = vector.shape_cast %293 : vector<16x32xf32> to vector<2x8x32xf32>
    %c0_138 = arith.constant 0 : index
    %c0_139 = arith.constant 0 : index
    %c0_140 = arith.constant 0 : index
    %295 = vector.load %arg19[%c0_138, %c0_139, %c0_140] : memref<2x8x32xf32, #tpu.memory_space<vmem>>, vector<2x8x32xf32>
    tpu.vector_store %arg19[%c0_138, %c0_139, %c0_140], %294 {strides = array<i32>} : memref<2x8x32xf32, #tpu.memory_space<vmem>>, vector<2x8x32xf32>,
    return
  }
  func.func @transform_0(%arg0: i32) -> (i32, i32, i32) {
    %c0_i32 = arith.constant 0 : i32
    %c0_i32_0 = arith.constant 0 : i32
    %c0_i32_1 = arith.constant 0 : i32
    return %arg0, %c0_i32, %c0_i32_0 : i32, i32, i32
  }
  func.func @transform_1(%arg0: i32) -> (i32, i32) {
    %c0_i32 = arith.constant 0 : i32
    %c0_i32_0 = arith.constant 0 : i32
    %c0_i32_1 = arith.constant 0 : i32
    return %c0_i32, %c0_i32_0 : i32, i32
  }
  func.func @transform_2(%arg0: i32) -> (i32, i32) {
    %c0_i32 = arith.constant 0 : i32
    %c0_i32_0 = arith.constant 0 : i32
    %c0_i32_1 = arith.constant 0 : i32
    return %c0_i32, %c0_i32_0 : i32, i32
  }
  func.func @transform_3(%arg0: i32) -> (i32, i32, i32) {
    %c0_i32 = arith.constant 0 : i32
    %c0_i32_0 = arith.constant 0 : i32
    %c0_i32_1 = arith.constant 0 : i32
    %c0_i32_2 = arith.constant 0 : i32
    return %c0_i32, %c0_i32_0, %c0_i32_1 : i32, i32, i32
  }
  func.func @transform_4(%arg0: i32) -> (i32, i32) {
    %c0_i32 = arith.constant 0 : i32
    %c0_i32_0 = arith.constant 0 : i32
    %c0_i32_1 = arith.constant 0 : i32
    return %c0_i32, %c0_i32_0 : i32, i32
  }
  func.func @transform_5(%arg0: i32) -> (i32, i32, i32) {
    %c0_i32 = arith.constant 0 : i32
    %c0_i32_0 = arith.constant 0 : i32
    %c0_i32_1 = arith.constant 0 : i32
    %c0_i32_2 = arith.constant 0 : i32
    return %c0_i32, %c0_i32_0, %c0_i32_1 : i32, i32, i32
  }
  func.func @transform_6(%arg0: i32) -> (i32, i32) {
    %c0_i32 = arith.constant 0 : i32
    %c0_i32_0 = arith.constant 0 : i32
    %c0_i32_1 = arith.constant 0 : i32
    return %c0_i32, %c0_i32_0 : i32, i32
  }
  func.func @transform_7(%arg0: i32) -> (i32, i32, i32) {
    %c0_i32 = arith.constant 0 : i32
    %c0_i32_0 = arith.constant 0 : i32
    %c0_i32_1 = arith.constant 0 : i32
    %c0_i32_2 = arith.constant 0 : i32
    return %c0_i32, %c0_i32_0, %c0_i32_1 : i32, i32, i32
  }
  func.func @transform_8(%arg0: i32) -> (i32, i32) {
    %c0_i32 = arith.constant 0 : i32
    %c0_i32_0 = arith.constant 0 : i32
    %c0_i32_1 = arith.constant 0 : i32
    return %c0_i32, %c0_i32_0 : i32, i32
  }
  func.func @transform_9(%arg0: i32) -> (i32, i32, i32) {
    %c0_i32 = arith.constant 0 : i32
    %c0_i32_0 = arith.constant 0 : i32
    %c0_i32_1 = arith.constant 0 : i32
    %c0_i32_2 = arith.constant 0 : i32
    return %c0_i32, %c0_i32_0, %c0_i32_1 : i32, i32, i32
  }
  func.func @transform_10(%arg0: i32) -> (i32, i32) {
    %c0_i32 = arith.constant 0 : i32
    %c0_i32_0 = arith.constant 0 : i32
    %c0_i32_1 = arith.constant 0 : i32
    return %c0_i32, %c0_i32_0 : i32, i32
  }
  func.func @transform_11(%arg0: i32) -> (i32, i32) {
    %c0_i32 = arith.constant 0 : i32
    %c0_i32_0 = arith.constant 0 : i32
    %c0_i32_1 = arith.constant 0 : i32
    return %c0_i32, %c0_i32_0 : i32, i32
  }
  func.func @transform_12(%arg0: i32) -> (i32, i32) {
    %c0_i32 = arith.constant 0 : i32
    %c0_i32_0 = arith.constant 0 : i32
    %c0_i32_1 = arith.constant 0 : i32
    return %c0_i32, %c0_i32_0 : i32, i32
  }
  func.func @transform_13(%arg0: i32) -> (i32, i32) {
    %c0_i32 = arith.constant 0 : i32
    %c0_i32_0 = arith.constant 0 : i32
    %c0_i32_1 = arith.constant 0 : i32
    return %c0_i32, %c0_i32_0 : i32, i32
  }
  func.func @transform_14(%arg0: i32) -> (i32, i32) {
    %c0_i32 = arith.constant 0 : i32
    %c0_i32_0 = arith.constant 0 : i32
    %c0_i32_1 = arith.constant 0 : i32
    return %c0_i32, %c0_i32_0 : i32, i32
  }
  func.func @transform_15(%arg0: i32) -> (i32, i32) {
    %c0_i32 = arith.constant 0 : i32
    %c0_i32_0 = arith.constant 0 : i32
    %c0_i32_1 = arith.constant 0 : i32
    return %c0_i32, %c0_i32_0 : i32, i32
  }
  func.func @transform_16(%arg0: i32) -> (i32, i32) {
    %c0_i32 = arith.constant 0 : i32
    %c0_i32_0 = arith.constant 0 : i32
    %c0_i32_1 = arith.constant 0 : i32
    return %c0_i32, %c0_i32_0 : i32, i32
  }
  func.func @transform_17(%arg0: i32) -> (i32, i32) {
    %c0_i32 = arith.constant 0 : i32
    %c0_i32_0 = arith.constant 0 : i32
    %c0_i32_1 = arith.constant 0 : i32
    return %c0_i32, %c0_i32_0 : i32, i32
  }
  func.func @transform_18(%arg0: i32) -> (i32, i32, i32) {
    %c0_i32 = arith.constant 0 : i32
    %c0_i32_0 = arith.constant 0 : i32
    %c0_i32_1 = arith.constant 0 : i32
    return %arg0, %c0_i32, %c0_i32_0 : i32, i32, i32
  }
}

</mosaic_0001>

<bundles_post_ra>
// kernel: tpu_custom_call.1
= control target key start
LH: loop header
LB: loop body
LE: loop exit
PB: predicated region body
PF: predicated region fallthrough
CT: control target
= control target key end

     0   :  { %s3412_s0 = inlined_call_operand.vmem [shape: f32[2,8,32], index: 0, kind: input, shape index: {}]   ;;  %s3413_s1 = inlined_call_operand.vmem [shape: f32[1,32], index: 1, kind: input, shape index: {}]   ;;  %s3414_s2 = inlined_call_operand.vmem [shape: f32[1,32], index: 2, kind: input, shape index: {}]   ;;  %s3415_s3 = inlined_call_operand.vmem [shape: bf16[4,32,8], index: 3, kind: input, shape index: {}]   ;;  %s3416_s4 = inlined_call_operand.vmem [shape: f32[4,8], index: 4, kind: input, shape index: {}]   ;;  %s3417_s5 = inlined_call_operand.vmem [shape: bf16[4,32,8], index: 5, kind: input, shape index: {}]   ;;  %s3418_s6 = inlined_call_operand.vmem [shape: f32[4,8], index: 6, kind: input, shape index: {}]   ;;  %s3419_s7 = inlined_call_operand.vmem [shape: bf16[4,32,8], index: 7, kind: input, shape index: {}]   ;;  %s3420_s8 = inlined_call_operand.vmem [shape: f32[4,8], index: 8, kind: input, shape index: {}]   ;;  %s3421_s9 = inlined_call_operand.vmem [shape: bf16[4,8,32], index: 9, kind: input, shape index: {}]   ;;  %s3422_s10 = inlined_call_operand.vmem [shape: f32[1,32], index: 10, kind: input, shape index: {}]   ;;  %s3423_s11 = inlined_call_operand.vmem [shape: f32[1,32], index: 11, kind: input, shape index: {}]   ;;  %s3424_s12 = inlined_call_operand.vmem [shape: f32[1,32], index: 12, kind: input, shape index: {}]   ;;  %s3425_s13 = inlined_call_operand.vmem [shape: bf16[32,128], index: 13, kind: input, shape index: {}]   ;;  %s3426_s14 = inlined_call_operand.vmem [shape: f32[1,128], index: 14, kind: input, shape index: {}]   ;;  %s3427_s15 = inlined_call_operand.vmem [shape: bf16[128,32], index: 15, kind: input, shape index: {}]   ;;  %s3428_s16 = inlined_call_operand.vmem [shape: f32[1,32], index: 16, kind: input, shape index: {}]   ;;  %s3429_s17 = inlined_call_operand.vmem [shape: f32[8,8], index: 17, kind: input, shape index: {}]   ;;  %s3430_s18 = inlined_call_operand.hbm [shape: f32[2,8,32], index: 18, kind: output, shape index: {}]  }
   0x1   :  { %3432 = sst [smem:[#allocation5_spill]] %s3412_s0 }
   0x2   :  { %3433 = sst [smem:[#allocation6_spill]] %s3413_s1 }
   0x3   :  { %3434 = sst [smem:[#allocation7_spill]] %s3414_s2 }
   0x4   :  { %s3435_s29 = sld [smem:[#allocation5_spill]]  ;;  %vm65_vm0 = vcmask 261120  }
   0xa   :  { %v61_v0 = vld [vmem:[%s3435_s29] sm:$0xff]  ;;  %v62_v1 = vld [vmem:[%s3435_s29 + $0x8] sm:$0xff] }
   0xb   :  { %v66_v2 = vsel %vm65_vm0, %v61_v0, 0.0  ;;  %v69_v3 = vsel %vm65_vm0, %v62_v1, 0.0 }
   0xc   :  { %67 = vadd.xlane.f32.xlu0 %v66_v2 }
  0x10   :  { %70 = vadd.xlane.f32.xlu0 %v69_v3 }
  0x11   :  { %23 = vsyncpa [#allocation3], 0  ;;  %v2752_v14 = vld [vmem:[%s3415_s3 + $0x8] sm:$0xff]   ;;  %v2854_v15 = vmov 0.0   ;;  %v2753_v16 = vld [vmem:[%s3415_s3] sm:$0xff]   ;;  %vm2855_vm1 = vmmov 0  }
  0x12   :  { %2503 = vmatprep.subr.bf16.mxu0 %v2854_v15  ;;  %2527 = vmatprep.subr.bf16.mxu1 %v2854_v15  ;;  %s3436_s23 = sld [smem:[#allocation6_spill]]  ;;  %v2754_v33 = vld [vmem:[%s3417_s5 + $0x8] sm:$0xff]   ;;  %v2755_v35 = vld [vmem:[%s3417_s5] sm:$0xff]   ;;  %vm318_vm2 = vcmask 64512   ;;  %vm434_vm3 = vcmask 1043456  }
  0x13   :  { %2504 = vmatpush3.bf16.msra.mxu0 %v2752_v14  ;;  %2507 = vmatprep.mubr.msk.bf16.mxu0 %vm2855_vm1, %v2854_v15  ;;  %s3437_s26 = sld [smem:[#allocation7_spill]]  ;;  %v2756_v36 = vld [vmem:[%s3419_s7 + $0x8] sm:$0xff]   ;;  %v2757_v37 = vld [vmem:[%s3419_s7] sm:$0xff]  }
  0x14   :  { %2505 = vmatprep.subr.bf16.mxu0 %v2854_v15  ;;  %2529 = vmatprep.mubr.msk.bf16.mxu1 %vm2855_vm1, %v2854_v15  ;;  %v2248_v42 = vld [vmem:[%s3418_s6] ss:$0 sm:$0xff] }
  0x15   :  { %v2244_v47 = vld [vmem:[%s3416_s4] ss:$0 sm:$0xff] }
  0x16   :  { %v2252_v52 = vld [vmem:[%s3420_s8] ss:$0 sm:$0xff] }
  0x17   :  { %2506 = vmatpush3.bf16.msra.mxu0 %v2753_v16 }
  0x18   :  { %2511 = vmatprep.subr.bf16.mxu0 %v2854_v15  ;;  %v2242_v25 = vld [vmem:[%s3436_s23] ss:$0 sm:$0xff] }
  0x19   :  { %v2243_v29 = vld [vmem:[%s3437_s26] ss:$0 sm:$0xff] }
  0x95   :  { %v68_v4 = vpop.xlane.xlu0 %67 }
  0x96   :  { %v73_v5 = vmul.f32 0.03125, %v68_v4 }
  0x98   :  { %v75_v6 = vsub.f32 %v61_v0, %v73_v5  ;;  %v3040_v5 = vld [vmem:[%s3429_s17] sm:$0xff]  ;;  %s2856_s17 = smov [#allocation2]  }
  0x99   :  { %v71_v7 = vpop.xlane.xlu0 %70 }
  0x9a   :  { %v74_v8 = vmul.f32 0.03125, %v71_v7  ;;  %v77_v9 = vmul.f32 %v75_v6, %v75_v6 }
  0x9c   :  { %v76_v10 = vsub.f32 %v62_v1, %v74_v8  ;;  %v79_v11 = vsel %vm65_vm0, %v77_v9, 0.0 }
  0x9d   :  { %80 = vadd.xlane.f32.xlu1 %v79_v11 }
  0x9e   :  { %v78_v12 = vmul.f32 %v76_v10, %v76_v10 }
  0xa0   :  { %v82_v13 = vsel %vm65_vm0, %v78_v12, 0.0 }
  0xa1   :  { %83 = vadd.xlane.f32.xlu1 %v82_v13 }
 0x126   :  { %v81_v17 = vpop.xlane.xlu1 %80 }
 0x127   :  { %v85_v18 = vmul.f32 0.03125, %v81_v17 }
 0x129   :  { %v87_v19 = vadd.f32 1e-05, %v85_v18 }
 0x12a   :  { %v84_v20 = vpop.xlane.xlu1 %83 }
 0x12b   :  { %2786 = vrsqrt.f32 %v87_v19  ;;  %v86_v21 = vmul.f32 0.03125, %v84_v20 }
 0x12d   :  { %v88_v22 = vadd.f32 1e-05, %v86_v21 }
 0x12f   :  { %2788 = vrsqrt.f32 %v88_v22 }
 0x138   :  { %v2787_v23 = vpop.eup %2786 }
 0x139   :  { %v91_v24 = vmul.f32 %v2787_v23, %v75_v6 }
 0x13b   :  { %v99_v27 = vmul.f32 %v2242_v25, %v91_v24 }
 0x13c   :  { %v2789_v26 = vpop.eup %2788 }
 0x13d   :  { %v92_v28 = vmul.f32 %v2789_v26, %v76_v10  ;;  %v107_v31 = vadd.f32 %v2243_v29, %v99_v27  ;;  %v2758_v26 = vld [vmem:[%s3415_s3 + $0x18] sm:$0xff]  }
 0x13f   :  { %v100_v30 = vmul.f32 %v2242_v25, %v92_v28 }
 0x141   :  { %v108_v32 = vadd.f32 %v2243_v29, %v100_v30  ;;  %v2759_v29 = vld [vmem:[%s3415_s3 + $0x10] sm:$0xff]   ;;  %v2760_v30 = vld [vmem:[%s3417_s5 + $0x18] sm:$0xff]  }
 0x143   :  { %v2987_v34 = vpack.c.bf16 %v108_v32, %v107_v31  ;;  %v2761_v32 = vld [vmem:[%s3417_s5 + $0x10] sm:$0xff]  }
 0x145   :  { %2508 = vmatmul.mubr.msk.bf16.vlgmr.msra.gmra.mxu0 %vm65_vm0, %v2987_v34 }
 0x146   :  { %2512 = vmatpush3.bf16.msra.mxu0 %v2754_v33  ;;  %2515 = vmatprep.mubr.msk.bf16.mxu0 %vm2855_vm1, %v2854_v15  ;;  %v2762_v33 = vld [vmem:[%s3419_s7 + $0x18] sm:$0xff]  }
 0x147   :  { %2513 = vmatprep.subr.bf16.mxu0 %v2854_v15 }
 0x14a   :  { %2514 = vmatpush3.bf16.msra.mxu0 %v2755_v35  ;;  %v2763_v35 = vld [vmem:[%s3419_s7 + $0x10] sm:$0xff]  }
 0x14b   :  { %2519 = vmatprep.subr.bf16.mxu0 %v2854_v15 }
 0x14d   :  { %2516 = vmatmul.mubr.msk.bf16.vlgmr.msra.gmra.mxu0 %vm65_vm0, %v2987_v34 }
 0x14e   :  { %2520 = vmatpush3.bf16.msra.mxu0 %v2756_v36  ;;  %2523 = vmatprep.mubr.msk.bf16.mxu0 %vm2855_vm1, %v2854_v15 }
 0x14f   :  { %2521 = vmatprep.subr.bf16.mxu0 %v2854_v15 }
 0x152   :  { %2522 = vmatpush3.bf16.msra.mxu0 %v2757_v37 }
 0x153   :  { %2533 = vmatprep.subr.bf16.mxu0 %v2854_v15 }
 0x155   :  { %2524 = vmatmul.mubr.msk.bf16.vlgmr.msra.gmra.mxu0 %vm65_vm0, %v2987_v34 }
 0x156   :  { %2535 = vmatprep.mubr.msk.bf16.mxu0 %vm2855_vm1, %v2854_v15 }
 0x205   :  { %v169_v38 = vpop.f32.mrf.mxu0 }
 0x206   :  { %v170_v53 = vadd.f32 %v2244_v47, %v169_v38 }
 0x207   :  { %v2509_v39 = vpop.f32.mrf.mxu0 }
 0x208   :  { %v2391_v59 = vpack.c.bf16 %v170_v53, %v170_v53 }
 0x209   :  { %v172_v40 = vpop.f32.mrf.mxu0 }
 0x20a   :  { %v173_v60 = vadd.f32 %v2244_v47, %v172_v40 }
 0x20b   :  { %v2510_v41 = vpop.f32.mrf.mxu0 }
 0x20c   :  { %v2392_v2 = vpack.c.bf16 %v173_v60, %v173_v60 }
 0x20d   :  { %v231_v43 = vpop.f32.mrf.mxu0 }
 0x20e   :  { %v232_v44 = vadd.f32 %v2248_v42, %v231_v43 }
 0x20f   :  { %v2517_v45 = vpop.f32.mrf.mxu0 }
 0x210   :  { %v2393_v46 = vpack.c.bf16 %v232_v44, %v232_v44 }
 0x211   :  { %v234_v48 = vpop.f32.mrf.mxu0 }
 0x212   :  { %v235_v49 = vadd.f32 %v2248_v42, %v234_v48  ;;  %v323_v50 = vsel %vm318_vm2, %v2393_v46, 0  ;;  %v2278_v46 = vld [vmem:[%s3418_s6 + $0x1] ss:$0 sm:$0xff] }
 0x213   :  { %v2518_v51 = vpop.f32.mrf.mxu0  ;;  %2528 = vmatpush3.bf16.xpose.msra.mxu1 %v323_v50 }
 0x214   :  { %v2394_v54 = vpack.c.bf16 %v235_v49, %v235_v49  ;;  %2539 = vmatprep.subr.bf16.mxu1 %v2854_v15 }
 0x215   :  { %v293_v55 = vpop.f32.mrf.mxu0 }
 0x216   :  { %v369_v56 = vsel %vm318_vm2, %v2394_v54, 0  ;;  %v294_v57 = vadd.f32 %v2252_v52, %v293_v55  ;;  %v2270_v54 = vld [vmem:[%s3416_s4 + $0x1] ss:$0 sm:$0xff] }
 0x217   :  { %v2525_v58 = vpop.f32.mrf.mxu0  ;;  %2534 = vmatpush3.bf16.xpose.msra.mxu0 %v369_v56 }
 0x218   :  { %v2395_v61 = vpack.c.bf16 %v294_v57, %v294_v57  ;;  %2545 = vmatprep.subr.bf16.mxu0 %v2854_v15 }
 0x219   :  { %v296_v62 = vpop.f32.mrf.mxu0 }
 0x21a   :  { %v436_v63 = vsel %vm434_vm3, %v2395_v61, 0  ;;  %v297_v0 = vadd.f32 %v2252_v52, %v296_v62  ;;  %2530 = vmatmul.mubr.msk.bf16.vlgmr.msra.gmra.mxu1 %vm318_vm2, %v2391_v59  ;;  %v2286_v52 = vld [vmem:[%s3420_s8 + $0x1] ss:$0 sm:$0xff] }
 0x21b   :  { %v2526_v1 = vpop.f32.mrf.mxu0  ;;  %2540 = vmatpush3.bf16.msra.mxu1 %v436_v63  ;;  %2541 = vmatprep.mubr.msk.bf16.mxu1 %vm2855_vm1, %v2854_v15 }
 0x21c   :  { %v2396_v3 = vpack.c.bf16 %v297_v0, %v297_v0  ;;  %2551 = vmatprep.subr.bf16.mxu1 %v2854_v15 }
 0x21e   :  { %v482_v4 = vsel %vm434_vm3, %v2396_v3, 0  ;;  %2536 = vmatmul.mubr.msk.bf16.vlgmr.msra.gmra.mxu0 %vm318_vm2, %v2392_v2 }
 0x21f   :  { %2546 = vmatpush3.bf16.msra.mxu0 %v482_v4  ;;  %2547 = vmatprep.mubr.msk.bf16.mxu0 %vm2855_vm1, %v2854_v15 }
 0x220   :  { %2559 = vmatprep.subr.bf16.mxu0 %v2854_v15 }
 0x2da   :  { %v359_v6 = vpop.f32.mrf.mxu1 }
 0x2db   :  { %v360_v7 = vadd.f32 %v359_v6, %v3040_v5 }
 0x2dc   :  { %v2531_v8 = vpop.f32.mrf.mxu1 }
 0x2dd   :  { %v411_v9 = vsel %vm318_vm2, %v360_v7, -inf }
 0x2de   :  { %412 = vmax.xlane.f32.xlu1 %v411_v9  ;;  %v362_v10 = vpop.f32.mrf.mxu1  ;;  %v405_v11 = vpop.f32.mrf.mxu0 }
 0x2df   :  { %v406_v12 = vadd.f32 %v405_v11, %v3040_v5 }
 0x2e0   :  { %v2532_v13 = vpop.f32.mrf.mxu1  ;;  %v2537_v14 = vpop.f32.mrf.mxu0 }
 0x2e1   :  { %v414_v16 = vsel %vm318_vm2, %v406_v12, -inf }
 0x2e2   :  { %415 = vmax.xlane.f32.xlu0 %v414_v16  ;;  %v408_v17 = vpop.f32.mrf.mxu0 }
 0x2e4   :  { %v2538_v18 = vpop.f32.mrf.mxu0 }
 0x367   :  { %v413_v19 = vpop.xlane.xlu1 %412 }
 0x368   :  { %v417_v20 = vsub.f32 %v360_v7, %v413_v19 }
 0x36a   :  { %v419_v21 = vmul.f32 1.442695, %v417_v20 }
 0x36b   :  { %v416_v22 = vpop.xlane.xlu0 %415 }
 0x36c   :  { %2790 = vpow2.f32 %v419_v21  ;;  %v418_v23 = vsub.f32 %v406_v12, %v416_v22 }
 0x36e   :  { %v421_v24 = vmul.f32 1.442695, %v418_v23 }
 0x370   :  { %2792 = vpow2.f32 %v421_v24 }
 0x379   :  { %v3046_v25 = vpop.eup %2790 }
 0x37a   :  { %v429_v27 = vpack.c.bf16 %v3046_v25, %v3046_v25  ;;  %v423_v23 = vsel %vm318_vm2, %v3046_v25, 0.0 }
 0x37c   :  { %2542 = vmatmul.mubr.msk.bf16.vlgmr.msra.gmra.mxu1 %vm318_vm2, %v429_v27 }
 0x37d   :  { %v3054_v28 = vpop.eup %2792  ;;  %2552 = vmatpush3.bf16.msra.mxu1 %v2758_v26  ;;  %2555 = vmatprep.mubr.msk.bf16.mxu1 %vm2855_vm1, %v2854_v15 }
 0x37e   :  { %v430_v31 = vpack.c.bf16 %v3054_v28, %v3054_v28  ;;  %2553 = vmatprep.subr.bf16.mxu1 %v2854_v15  ;;  %v426_v27 = vsel %vm318_vm2, %v3054_v28, 0.0  ;;  %v529_v28 = vld [vmem:[%s3421_s9] sm:$0xf] }
 0x380   :  { %2548 = vmatmul.mubr.msk.bf16.vlgmr.msra.gmra.mxu0 %vm318_vm2, %v430_v31 }
 0x381   :  { %2554 = vmatpush3.bf16.msra.mxu1 %v2759_v29  ;;  %2560 = vmatpush3.bf16.msra.mxu0 %v2760_v30 }
 0x382   :  { %2561 = vmatprep.subr.bf16.mxu0 %v2854_v15  ;;  %2567 = vmatprep.subr.bf16.mxu1 %v2854_v15 }
 0x383   :  { %2563 = vmatprep.mubr.msk.bf16.mxu0 %vm2855_vm1, %v2854_v15 }
 0x384   :  { %2556 = vmatmul.mubr.msk.bf16.vlgmr.msra.gmra.mxu1 %vm65_vm0, %v2987_v34 }
 0x385   :  { %2562 = vmatpush3.bf16.msra.mxu0 %v2761_v32  ;;  %2568 = vmatpush3.bf16.msra.mxu1 %v2762_v33 }
 0x386   :  { %2569 = vmatprep.subr.bf16.mxu1 %v2854_v15  ;;  %2571 = vmatprep.mubr.msk.bf16.mxu1 %vm2855_vm1, %v2854_v15 }
 0x387   :  { %2575 = vmatprep.subr.bf16.mxu0 %v2854_v15 }
 0x388   :  { %2564 = vmatmul.mubr.msk.bf16.vlgmr.msra.gmra.mxu0 %vm65_vm0, %v2987_v34 }
 0x389   :  { %2570 = vmatpush3.bf16.msra.mxu1 %v2763_v35  ;;  %2577 = vmatprep.mubr.msk.bf16.mxu0 %vm2855_vm1, %v2854_v15 }
 0x38a   :  { %2581 = vmatprep.subr.bf16.mxu1 %v2854_v15 }
 0x38c   :  { %2572 = vmatmul.mubr.msk.bf16.vlgmr.msra.gmra.mxu1 %vm65_vm0, %v2987_v34 }
 0x38d   :  { %2583 = vmatprep.mubr.msk.bf16.mxu1 %vm2855_vm1, %v2854_v15 }
 0x43c   :  { %v3096_v36 = vpop.f32.mrf.mxu1 }
 0x43e   :  { %v2543_v37 = vpop.f32.mrf.mxu1 }
 0x440   :  { %v475_v38 = vpop.f32.mrf.mxu1  ;;  %v3098_v39 = vpop.f32.mrf.mxu0 }
 0x442   :  { %v2544_v40 = vpop.f32.mrf.mxu1  ;;  %v2549_v41 = vpop.f32.mrf.mxu0 }
 0x444   :  { %v521_v42 = vpop.f32.mrf.mxu0  ;;  %v586_v43 = vpop.f32.mrf.mxu1 }
 0x445   :  { %v587_v62 = vadd.f32 %v2270_v54, %v586_v43 }
 0x446   :  { %v2550_v44 = vpop.f32.mrf.mxu0  ;;  %v2557_v45 = vpop.f32.mrf.mxu1 }
 0x447   :  { %v2397_v6 = vpack.c.bf16 %v587_v62, %v587_v62  ;;  %v999_v45 = vsel %vm434_vm3, %v529_v28, 0 }
 0x448   :  { %v589_v47 = vpop.f32.mrf.mxu1  ;;  %v649_v48 = vpop.f32.mrf.mxu0 }
 0x449   :  { %v650_v49 = vadd.f32 %v2278_v46, %v649_v48  ;;  %v590_v7 = vadd.f32 %v2270_v54, %v589_v47 }
 0x44a   :  { %v2558_v50 = vpop.f32.mrf.mxu1  ;;  %v2565_v51 = vpop.f32.mrf.mxu0 }
 0x44b   :  { %v2399_v53 = vpack.c.bf16 %v650_v49, %v650_v49  ;;  %v2398_v10 = vpack.c.bf16 %v590_v7, %v590_v7  ;;  %v2764_v50 = vld [vmem:[%s3417_s5 + $0x28] sm:$0xff]  }
 0x44c   :  { %v652_v55 = vpop.f32.mrf.mxu0  ;;  %v712_v56 = vpop.f32.mrf.mxu1 }
 0x44d   :  { %v741_v57 = vsel %vm318_vm2, %v2399_v53, 0  ;;  %v653_v58 = vadd.f32 %v2278_v46, %v652_v55  ;;  %v713_v59 = vadd.f32 %v2286_v52, %v712_v56 }
 0x44e   :  { %v2566_v60 = vpop.f32.mrf.mxu0  ;;  %v2573_v61 = vpop.f32.mrf.mxu1  ;;  %2576 = vmatpush3.bf16.xpose.msra.mxu0 %v741_v57 }
 0x44f   :  { %v2400_v63 = vpack.c.bf16 %v653_v58, %v653_v58  ;;  %2587 = vmatprep.subr.bf16.mxu0 %v2854_v15  ;;  %v2401_v2 = vpack.c.bf16 %v713_v59, %v713_v59 }
 0x450   :  { %v715_v0 = vpop.f32.mrf.mxu1 }
 0x451   :  { %v787_v1 = vsel %vm318_vm2, %v2400_v63, 0  ;;  %v716_v3 = vadd.f32 %v2286_v52, %v715_v0  ;;  %v853_v8 = vsel %vm434_vm3, %v2401_v2, 0  ;;  %v2765_v52 = vld [vmem:[%s3417_s5 + $0x20] sm:$0xff]  }
 0x452   :  { %v2574_v4 = vpop.f32.mrf.mxu1  ;;  %2582 = vmatpush3.bf16.xpose.msra.mxu1 %v787_v1  ;;  %v2766_v1 = vld [vmem:[%s3415_s3 + $0x28] sm:$0xff]  }
 0x453   :  { %2593 = vmatprep.subr.bf16.mxu1 %v2854_v15  ;;  %v2402_v9 = vpack.c.bf16 %v716_v3, %v716_v3 }
 0x455   :  { %2578 = vmatmul.mubr.msk.bf16.vlgmr.msra.gmra.mxu0 %vm318_vm2, %v2397_v6  ;;  %v899_v11 = vsel %vm434_vm3, %v2402_v9, 0  ;;  %v2767_v6 = vld [vmem:[%s3415_s3 + $0x20] sm:$0xff]   ;;  %v2768_v9 = vld [vmem:[%s3419_s7 + $0x28] sm:$0xff]  }
 0x456   :  { %2588 = vmatpush3.bf16.msra.mxu0 %v853_v8  ;;  %2589 = vmatprep.mubr.msk.bf16.mxu0 %vm2855_vm1, %v2854_v15 }
 0x457   :  { %2599 = vmatprep.subr.bf16.mxu0 %v2854_v15 }
 0x459   :  { %2584 = vmatmul.mubr.msk.bf16.vlgmr.msra.gmra.mxu1 %vm318_vm2, %v2398_v10 }
 0x45a   :  { %2594 = vmatpush3.bf16.msra.mxu1 %v899_v11  ;;  %2595 = vmatprep.mubr.msk.bf16.mxu1 %vm2855_vm1, %v2854_v15 }
 0x45b   :  { %2605 = vmatprep.subr.bf16.mxu1 %v2854_v15 }
 0x515   :  { %v777_v12 = vpop.f32.mrf.mxu0 }
 0x516   :  { %v778_v13 = vadd.f32 %v777_v12, %v3040_v5  ;;  %v2315_v12 = vld [vmem:[%s3418_s6 + $0x2] ss:$0 sm:$0xff] }
 0x517   :  { %v2579_v14 = vpop.f32.mrf.mxu0 }
 0x518   :  { %v829_v16 = vsel %vm318_vm2, %v778_v13, -inf }
 0x519   :  { %v823_v17 = vpop.f32.mrf.mxu1  ;;  %830 = vmax.xlane.f32.xlu0 %v829_v16  ;;  %v780_v18 = vpop.f32.mrf.mxu0 }
 0x51a   :  { %v824_v19 = vadd.f32 %v823_v17, %v3040_v5 }
 0x51b   :  { %v2580_v20 = vpop.f32.mrf.mxu0  ;;  %v2585_v21 = vpop.f32.mrf.mxu1 }
 0x51c   :  { %v832_v22 = vsel %vm318_vm2, %v824_v19, -inf }
 0x51d   :  { %833 = vmax.xlane.f32.xlu1 %v832_v22  ;;  %v826_v24 = vpop.f32.mrf.mxu1  ;;  %424 = vadd.xlane.f32.xlu0 %v423_v23 }
 0x51f   :  { %v2586_v26 = vpop.f32.mrf.mxu1 }
 0x521   :  { %427 = vadd.xlane.f32.xlu1 %v426_v27 }
 0x5a2   :  { %v831_v29 = vpop.xlane.xlu0 %830 }
 0x5a3   :  { %v835_v30 = vsub.f32 %v778_v13, %v831_v29  ;;  %v2769_v13 = vld [vmem:[%s3419_s7 + $0x20] sm:$0xff]  }
 0x5a5   :  { %v837_v31 = vmul.f32 1.442695, %v835_v30 }
 0x5a6   :  { %v834_v32 = vpop.xlane.xlu1 %833  ;;  %v425_v38 = vpop.xlane.xlu0 %424 }
 0x5a7   :  { %2794 = vpow2.f32 %v837_v31  ;;  %v836_v33 = vsub.f32 %v824_v19, %v834_v32  ;;  %v2307_v31 = vld [vmem:[%s3416_s4 + $0x2] ss:$0 sm:$0xff] }
 0x5a9   :  { %v839_v35 = vmul.f32 1.442695, %v836_v33 }
 0x5aa   :  { %v428_v37 = vpop.xlane.xlu1 %427 }
 0x5ab   :  { %2796 = vpow2.f32 %v839_v35 }
 0x5ac   :  { %2798 = vrcp.f32 %v428_v37 }
 0x5ad   :  { %2800 = vrcp.f32 %v425_v38 }
 0x5b4   :  { %v2795_v25 = vpop.eup %2794 }
 0x5b5   :  { %v841_v40 = vsel %vm318_vm2, %v2795_v25, 0.0  ;;  %v847_v41 = vpack.c.bf16 %v2795_v25, %v2795_v25 }
 0x5b6   :  { %842 = vadd.xlane.f32.xlu0 %v841_v40 }
 0x5b7   :  { %2590 = vmatmul.mubr.msk.bf16.vlgmr.msra.gmra.mxu0 %vm318_vm2, %v847_v41  ;;  %v2323_v41 = vld [vmem:[%s3420_s8 + $0x2] ss:$0 sm:$0xff] }
 0x5b8   :  { %v2797_v42 = vpop.eup %2796  ;;  %2601 = vmatprep.mubr.msk.bf16.mxu0 %vm2855_vm1, %v2854_v15 }
 0x5b9   :  { %v844_v43 = vsel %vm318_vm2, %v2797_v42, 0.0  ;;  %v848_v44 = vpack.c.bf16 %v2797_v42, %v2797_v42  ;;  %v2799_v46 = vpop.eup %2798 }
 0x5ba   :  { %845 = vadd.xlane.f32.xlu1 %v844_v43  ;;  %v2801_v47 = vpop.eup %2800  ;;  %v527_v48 = vmul.f32 %v2799_v46, %v3098_v39 }
 0x5bb   :  { %2596 = vmatmul.mubr.msk.bf16.vlgmr.msra.gmra.mxu1 %vm318_vm2, %v848_v44  ;;  %v526_v49 = vmul.f32 %v2801_v47, %v3096_v36  ;;  %v2300_v36 = vld [vmem:[%s3421_s9 + $0x4] sm:$0xf] }
 0x5bc   :  { %2606 = vmatpush3.bf16.msra.mxu1 %v999_v45  ;;  %2607 = vmatprep.mubr.msk.bf16.mxu1 %vm2855_vm1, %v2854_v15  ;;  %v952_v39 = vsel %vm434_vm3, %v2300_v36, 0 }
 0x5bd   :  { %2619 = vmatprep.subr.bf16.mxu1 %v2854_v15  ;;  %v528_v51 = vpack.c.bf16 %v527_v48, %v526_v49  ;;  %2600 = vmatpush3.bf16.msra.mxu0 %v952_v39 }
 0x5be   :  { %2611 = vmatprep.subr.bf16.mxu0 %v2854_v15 }
 0x5c3   :  { %2608 = vmatmul.mubr.msk.bf16.vlgmr.msra.gmra.mxu1 %vm318_vm2, %v528_v51 }
 0x5c4   :  { %2620 = vmatpush3.bf16.msra.mxu1 %v2764_v50  ;;  %2623 = vmatprep.mubr.msk.bf16.mxu1 %vm2855_vm1, %v2854_v15 }
 0x5c5   :  { %2621 = vmatprep.subr.bf16.mxu1 %v2854_v15 }
 0x5c8   :  { %2622 = vmatpush3.bf16.msra.mxu1 %v2765_v52 }
 0x5c9   :  { %2635 = vmatprep.subr.bf16.mxu1 %v2854_v15 }
 0x5cb   :  { %2624 = vmatmul.mubr.msk.bf16.vlgmr.msra.gmra.mxu1 %vm65_vm0, %v2987_v34 }
 0x5cc   :  { %2637 = vmatprep.mubr.msk.bf16.mxu1 %vm2855_vm1, %v2854_v15 }
 0x63f   :  { %v843_v53 = vpop.xlane.xlu0 %842 }
 0x640   :  { %2802 = vrcp.f32 %v843_v53 }
 0x643   :  { %v846_v54 = vpop.xlane.xlu1 %845 }
 0x644   :  { %2804 = vrcp.f32 %v846_v54 }
 0x64d   :  { %v2803_v57 = vpop.eup %2802 }
 0x651   :  { %v2805_v58 = vpop.eup %2804 }
 0x677   :  { %v889_v55 = vpop.f32.mrf.mxu0 }
 0x678   :  { %v943_v61 = vmul.f32 %v2803_v57, %v889_v55 }
 0x679   :  { %v2591_v56 = vpop.f32.mrf.mxu0 }
 0x67b   :  { %v892_v59 = vpop.f32.mrf.mxu0  ;;  %v935_v60 = vpop.f32.mrf.mxu1 }
 0x67c   :  { %v944_v62 = vmul.f32 %v2805_v58, %v935_v60 }
 0x67d   :  { %v2592_v63 = vpop.f32.mrf.mxu0  ;;  %v2597_v0 = vpop.f32.mrf.mxu1 }
 0x67e   :  { %v945_v2 = vpack.c.bf16 %v944_v62, %v943_v61 }
 0x67f   :  { %v938_v3 = vpop.f32.mrf.mxu1 }
 0x680   :  { %2602 = vmatmul.mubr.msk.bf16.vlgmr.msra.gmra.mxu0 %vm318_vm2, %v945_v2 }
 0x681   :  { %v2598_v4 = vpop.f32.mrf.mxu1  ;;  %2612 = vmatpush3.bf16.msra.mxu0 %v2766_v1  ;;  %2615 = vmatprep.mubr.msk.bf16.mxu0 %vm2855_vm1, %v2854_v15 }
 0x682   :  { %2613 = vmatprep.subr.bf16.mxu0 %v2854_v15 }
 0x683   :  { %v3176_v7 = vpop.f32.mrf.mxu1 }
 0x685   :  { %v2609_v8 = vpop.f32.mrf.mxu1  ;;  %2614 = vmatpush3.bf16.msra.mxu0 %v2767_v6 }
 0x686   :  { %2627 = vmatprep.subr.bf16.mxu0 %v2854_v15 }
 0x687   :  { %v3182_v10 = vpop.f32.mrf.mxu1 }
 0x688   :  { %2616 = vmatmul.mubr.msk.bf16.vlgmr.msra.gmra.mxu0 %vm65_vm0, %v2987_v34 }
 0x689   :  { %v2610_v11 = vpop.f32.mrf.mxu1  ;;  %2628 = vmatpush3.bf16.msra.mxu0 %v2768_v9  ;;  %2631 = vmatprep.mubr.msk.bf16.mxu0 %vm2855_vm1, %v2854_v15 }
 0x68a   :  { %2629 = vmatprep.subr.bf16.mxu0 %v2854_v15  ;;  %v2770_v11 = vld [vmem:[%s3415_s3 + $0x38] sm:$0xff]  }
 0x68b   :  { %v1161_v14 = vpop.f32.mrf.mxu1 }
 0x68c   :  { %v1162_v16 = vadd.f32 %v2315_v12, %v1161_v14  ;;  %v2771_v14 = vld [vmem:[%s3415_s3 + $0x30] sm:$0xff]  }
 0x68d   :  { %v2625_v17 = vpop.f32.mrf.mxu1  ;;  %2630 = vmatpush3.bf16.msra.mxu0 %v2769_v13 }
 0x68e   :  { %v2405_v18 = vpack.c.bf16 %v1162_v16, %v1162_v16  ;;  %2641 = vmatprep.subr.bf16.mxu0 %v2854_v15  ;;  %v2772_v16 = vld [vmem:[%s3419_s7 + $0x38] sm:$0xff]   ;;  %v2773_v17 = vld [vmem:[%s3419_s7 + $0x30] sm:$0xff]  }
 0x68f   :  { %v1164_v19 = vpop.f32.mrf.mxu1 }
 0x690   :  { %v1253_v20 = vsel %vm318_vm2, %v2405_v18, 0  ;;  %v1165_v21 = vadd.f32 %v2315_v12, %v1164_v19  ;;  %2632 = vmatmul.mubr.msk.bf16.vlgmr.msra.gmra.mxu0 %vm65_vm0, %v2987_v34  ;;  %v2337_v18 = vld [vmem:[%s3421_s9 + $0x8] sm:$0xf] }
 0x691   :  { %v2626_v22 = vpop.f32.mrf.mxu1  ;;  %2636 = vmatpush3.bf16.xpose.msra.mxu1 %v1253_v20  ;;  %2643 = vmatprep.mubr.msk.bf16.mxu0 %vm2855_vm1, %v2854_v15  ;;  %v1464_v19 = vsel %vm434_vm3, %v2337_v18, 0 }
 0x692   :  { %v2406_v23 = vpack.c.bf16 %v1165_v21, %v1165_v21  ;;  %2647 = vmatprep.subr.bf16.mxu1 %v2854_v15 }
 0x694   :  { %v1299_v24 = vsel %vm318_vm2, %v2406_v23, 0 }
 0x695   :  { %2642 = vmatpush3.bf16.xpose.msra.mxu0 %v1299_v24 }
 0x696   :  { %2653 = vmatprep.subr.bf16.mxu0 %v2854_v15 }
 0x740   :  { %v3204_v26 = vpop.f32.mrf.mxu0 }
 0x742   :  { %v2603_v27 = vpop.f32.mrf.mxu0 }
 0x744   :  { %v3206_v29 = vpop.f32.mrf.mxu0 }
 0x746   :  { %v2604_v30 = vpop.f32.mrf.mxu0 }
 0x748   :  { %v1098_v32 = vpop.f32.mrf.mxu0 }
 0x749   :  { %v1099_v33 = vadd.f32 %v2307_v31, %v1098_v32 }
 0x74a   :  { %v2617_v35 = vpop.f32.mrf.mxu0 }
 0x74b   :  { %v2403_v37 = vpack.c.bf16 %v1099_v33, %v1099_v33 }
 0x74c   :  { %v1101_v38 = vpop.f32.mrf.mxu0 }
 0x74d   :  { %v1102_v25 = vadd.f32 %v2307_v31, %v1101_v38  ;;  %2638 = vmatmul.mubr.msk.bf16.vlgmr.msra.gmra.mxu1 %vm318_vm2, %v2403_v37  ;;  %v2774_v38 = vld [vmem:[%s3417_s5 + $0x38] sm:$0xff]  }
 0x74e   :  { %v2618_v40 = vpop.f32.mrf.mxu0  ;;  %2649 = vmatprep.mubr.msk.bf16.mxu1 %vm2855_vm1, %v2854_v15 }
 0x74f   :  { %v2404_v28 = vpack.c.bf16 %v1102_v25, %v1102_v25 }
 0x750   :  { %v1224_v42 = vpop.f32.mrf.mxu0 }
 0x751   :  { %v1225_v43 = vadd.f32 %v2323_v41, %v1224_v42  ;;  %2644 = vmatmul.mubr.msk.bf16.vlgmr.msra.gmra.mxu0 %vm318_vm2, %v2404_v28  ;;  %v2775_v28 = vld [vmem:[%s3417_s5 + $0x30] sm:$0xff]  }
 0x752   :  { %v2633_v44 = vpop.f32.mrf.mxu0  ;;  %2655 = vmatprep.mubr.msk.bf16.mxu0 %vm2855_vm1, %v2854_v15 }
 0x753   :  { %v2407_v45 = vpack.c.bf16 %v1225_v43, %v1225_v43 }
 0x754   :  { %v1227_v46 = vpop.f32.mrf.mxu0 }
 0x755   :  { %v1365_v47 = vsel %vm434_vm3, %v2407_v45, 0  ;;  %v1228_v48 = vadd.f32 %v2323_v41, %v1227_v46 }
 0x756   :  { %v2634_v49 = vpop.f32.mrf.mxu0  ;;  %2648 = vmatpush3.bf16.msra.mxu1 %v1365_v47 }
 0x757   :  { %v2408_v50 = vpack.c.bf16 %v1228_v48, %v1228_v48  ;;  %2659 = vmatprep.subr.bf16.mxu1 %v2854_v15 }
 0x759   :  { %v1411_v51 = vsel %vm434_vm3, %v2408_v50, 0  ;;  %v1036_v50 = vadd.f32 %v3176_v7, %v3204_v26  ;;  %v2359_v7 = vld [vmem:[%s3420_s8 + $0x3] ss:$0 sm:$0xff] }
 0x75a   :  { %2654 = vmatpush3.bf16.msra.mxu0 %v1411_v51 }
 0x75b   :  { %2665 = vmatprep.subr.bf16.mxu0 %v2854_v15 }
 0x80d   :  { %v1289_v52 = vpop.f32.mrf.mxu1 }
 0x80e   :  { %v1290_v36 = vadd.f32 %v1289_v52, %v3040_v5 }
 0x80f   :  { %v2639_v39 = vpop.f32.mrf.mxu1 }
 0x810   :  { %v1341_v53 = vsel %vm318_vm2, %v1290_v36, -inf  ;;  %v1039_v39 = vadd.f32 %v3182_v10, %v3206_v29  ;;  %v2343_v10 = vld [vmem:[%s3416_s4 + $0x3] ss:$0 sm:$0xff] }
 0x811   :  { %1342 = vmax.xlane.f32.xlu0 %v1341_v53  ;;  %v1292_v54 = vpop.f32.mrf.mxu1  ;;  %v1335_v55 = vpop.f32.mrf.mxu0 }
 0x812   :  { %v1336_v56 = vadd.f32 %v1335_v55, %v3040_v5  ;;  %v2351_v55 = vld [vmem:[%s3418_s6 + $0x3] ss:$0 sm:$0xff] }
 0x813   :  { %v2640_v57 = vpop.f32.mrf.mxu1  ;;  %v2645_v58 = vpop.f32.mrf.mxu0 }
 0x814   :  { %v1344_v59 = vsel %vm318_vm2, %v1336_v56, -inf }
 0x815   :  { %1345 = vmax.xlane.f32.xlu1 %v1344_v59  ;;  %v1338_v60 = vpop.f32.mrf.mxu0 }
 0x817   :  { %v2646_v61 = vpop.f32.mrf.mxu0 }
 0x89a   :  { %v1343_v62 = vpop.xlane.xlu0 %1342 }
 0x89b   :  { %v1347_v63 = vsub.f32 %v1290_v36, %v1343_v62 }
 0x89d   :  { %v1349_v0 = vmul.f32 1.442695, %v1347_v63 }
 0x89e   :  { %v1346_v1 = vpop.xlane.xlu1 %1345 }
 0x89f   :  { %2806 = vpow2.f32 %v1349_v0  ;;  %v1348_v2 = vsub.f32 %v1336_v56, %v1346_v1 }
 0x8a1   :  { %v1351_v3 = vmul.f32 1.442695, %v1348_v2 }
 0x8a3   :  { %2808 = vpow2.f32 %v1351_v3 }
 0x8ac   :  { %v2807_v4 = vpop.eup %2806 }
 0x8ad   :  { %v1353_v6 = vsel %vm318_vm2, %v2807_v4, 0.0  ;;  %v1359_v8 = vpack.c.bf16 %v2807_v4, %v2807_v4 }
 0x8ae   :  { %1354 = vadd.xlane.f32.xlu0 %v1353_v6 }
 0x8af   :  { %2650 = vmatmul.mubr.msk.bf16.vlgmr.msra.gmra.mxu1 %vm318_vm2, %v1359_v8 }
 0x8b0   :  { %v2809_v9 = vpop.eup %2808  ;;  %2661 = vmatprep.mubr.msk.bf16.mxu1 %vm2855_vm1, %v2854_v15  ;;  %2660 = vmatpush3.bf16.msra.mxu1 %v1464_v19 }
 0x8b1   :  { %v1356_v12 = vsel %vm318_vm2, %v2809_v9, 0.0  ;;  %v1360_v13 = vpack.c.bf16 %v2809_v9, %v2809_v9  ;;  %2673 = vmatprep.subr.bf16.mxu1 %v2854_v15 }
 0x8b2   :  { %1357 = vadd.xlane.f32.xlu1 %v1356_v12 }
 0x8b3   :  { %2656 = vmatmul.mubr.msk.bf16.vlgmr.msra.gmra.mxu0 %vm318_vm2, %v1360_v13 }
 0x8b4   :  { %2666 = vmatpush3.bf16.msra.mxu0 %v2770_v11  ;;  %2669 = vmatprep.mubr.msk.bf16.mxu0 %vm2855_vm1, %v2854_v15 }
 0x8b5   :  { %2667 = vmatprep.subr.bf16.mxu0 %v2854_v15 }
 0x8b8   :  { %2668 = vmatpush3.bf16.msra.mxu0 %v2771_v14 }
 0x8b9   :  { %2681 = vmatprep.subr.bf16.mxu0 %v2854_v15 }
 0x8bb   :  { %2670 = vmatmul.mubr.msk.bf16.vlgmr.msra.gmra.mxu0 %vm65_vm0, %v2987_v34 }
 0x8bc   :  { %2682 = vmatpush3.bf16.msra.mxu0 %v2772_v16  ;;  %2685 = vmatprep.mubr.msk.bf16.mxu0 %vm2855_vm1, %v2854_v15 }
 0x8bd   :  { %2683 = vmatprep.subr.bf16.mxu0 %v2854_v15 }
 0x8c0   :  { %2684 = vmatpush3.bf16.msra.mxu0 %v2773_v17 }
 0x8c1   :  { %2695 = vmatprep.subr.bf16.mxu0 %v2854_v15 }
 0x8c3   :  { %2686 = vmatmul.mubr.msk.bf16.vlgmr.msra.gmra.mxu0 %vm65_vm0, %v2987_v34 }
 0x8c4   :  { %2697 = vmatprep.mubr.msk.bf16.mxu0 %vm2855_vm1, %v2854_v15 }
 0x937   :  { %v1355_v20 = vpop.xlane.xlu0 %1354 }
 0x938   :  { %2810 = vrcp.f32 %v1355_v20 }
 0x93b   :  { %v1358_v21 = vpop.xlane.xlu1 %1357 }
 0x93c   :  { %2812 = vrcp.f32 %v1358_v21 }
 0x945   :  { %v2811_v24 = vpop.eup %2810 }
 0x949   :  { %v2813_v27 = vpop.eup %2812 }
 0x96f   :  { %v1401_v22 = vpop.f32.mrf.mxu1 }
 0x970   :  { %v1455_v32 = vmul.f32 %v2811_v24, %v1401_v22 }
 0x971   :  { %v2651_v23 = vpop.f32.mrf.mxu1 }
 0x973   :  { %v1404_v30 = vpop.f32.mrf.mxu1  ;;  %v1447_v31 = vpop.f32.mrf.mxu0 }
 0x974   :  { %v1456_v33 = vmul.f32 %v2813_v27, %v1447_v31 }
 0x975   :  { %v2652_v35 = vpop.f32.mrf.mxu1  ;;  %v2657_v37 = vpop.f32.mrf.mxu0 }
 0x976   :  { %v1457_v25 = vpack.c.bf16 %v1456_v33, %v1455_v32 }
 0x977   :  { %v1450_v40 = vpop.f32.mrf.mxu0 }
 0x978   :  { %2662 = vmatmul.mubr.msk.bf16.vlgmr.msra.gmra.mxu1 %vm318_vm2, %v1457_v25 }
 0x979   :  { %v2658_v41 = vpop.f32.mrf.mxu0  ;;  %2674 = vmatpush3.bf16.msra.mxu1 %v2774_v38  ;;  %2677 = vmatprep.mubr.msk.bf16.mxu1 %vm2855_vm1, %v2854_v15 }
 0x97a   :  { %2675 = vmatprep.subr.bf16.mxu1 %v2854_v15 }
 0x97b   :  { %v1565_v42 = vpop.f32.mrf.mxu0 }
 0x97c   :  { %v1566_v63 = vadd.f32 %v2343_v10, %v1565_v42  ;;  %v2373_v42 = vld [vmem:[%s3421_s9 + $0xc] sm:$0xf] }
 0x97d   :  { %v2671_v43 = vpop.f32.mrf.mxu0  ;;  %2676 = vmatpush3.bf16.msra.mxu1 %v2775_v28 }
 0x97e   :  { %2689 = vmatprep.subr.bf16.mxu1 %v2854_v15  ;;  %v2409_v4 = vpack.c.bf16 %v1566_v63, %v1566_v63  ;;  %v1931_v43 = vsel %vm434_vm3, %v2373_v42, 0  ;;  %v2780_v42 = vld [vmem:[%s3427_s15 + $0x28] sm:$0xff]  }
 0x97f   :  { %v1568_v44 = vpop.f32.mrf.mxu0 }
 0x980   :  { %2678 = vmatmul.mubr.msk.bf16.vlgmr.msra.gmra.mxu1 %vm65_vm0, %v2987_v34  ;;  %v1569_v6 = vadd.f32 %v2343_v10, %v1568_v44 }
 0x981   :  { %v2672_v45 = vpop.f32.mrf.mxu0  ;;  %2691 = vmatprep.mubr.msk.bf16.mxu1 %vm2855_vm1, %v2854_v15 }
 0x982   :  { %v2410_v11 = vpack.c.bf16 %v1569_v6, %v1569_v6 }
 0x983   :  { %v1691_v46 = vpop.f32.mrf.mxu0 }
 0x984   :  { %v1692_v59 = vadd.f32 %v2359_v7, %v1691_v46 }
 0x985   :  { %v2687_v47 = vpop.f32.mrf.mxu0 }
 0x986   :  { %v2413_v1 = vpack.c.bf16 %v1692_v59, %v1692_v59 }
 0x987   :  { %v1694_v48 = vpop.f32.mrf.mxu0 }
 0x988   :  { %v1695_v2 = vadd.f32 %v2359_v7, %v1694_v48  ;;  %v1832_v8 = vsel %vm434_vm3, %v2413_v1, 0 }
 0x989   :  { %v2688_v49 = vpop.f32.mrf.mxu0 }
 0x98a   :  { %v2414_v9 = vpack.c.bf16 %v1695_v2, %v1695_v2 }
 0x98c   :  { %v1878_v12 = vsel %vm434_vm3, %v2414_v9, 0 }
 0xa38   :  { %v1500_v51 = vpop.f32.mrf.mxu1 }
 0xa39   :  { %v3282_v52 = vadd.f32 %v1500_v51, %v1036_v50 }
 0xa3a   :  { %v2663_v36 = vpop.f32.mrf.mxu1 }
 0xa3c   :  { %v1503_v53 = vpop.f32.mrf.mxu1 }
 0xa3d   :  { %v3286_v34 = vadd.f32 %v1503_v53, %v1039_v39 }
 0xa3e   :  { %v2664_v54 = vpop.f32.mrf.mxu1 }
 0xa40   :  { %v1628_v56 = vpop.f32.mrf.mxu1 }
 0xa41   :  { %v1629_v57 = vadd.f32 %v2351_v55, %v1628_v56 }
 0xa42   :  { %v2679_v26 = vpop.f32.mrf.mxu1 }
 0xa43   :  { %v2411_v58 = vpack.c.bf16 %v1629_v57, %v1629_v57 }
 0xa44   :  { %v1631_v29 = vpop.f32.mrf.mxu1 }
 0xa45   :  { %v1720_v60 = vsel %vm318_vm2, %v2411_v58, 0  ;;  %v1632_v61 = vadd.f32 %v2351_v55, %v1631_v29  ;;  %v2375_v58 = vld [vmem:[%s3422_s10] ss:$0 sm:$0xff]  ;;  %s2231_s10 = sshll.u32 %s2856_s17, 4  ;;  %s2232_s10 = int_to_ptr.vmem [resolvable:$true] %s2231_s10 }
 0xa46   :  { %v2680_v62 = vpop.f32.mrf.mxu1  ;;  %2690 = vmatpush3.bf16.xpose.msra.mxu1 %v1720_v60  ;;  %v2830_v29 = vld [vmem:[%s3435_s29] sm:$0xff]  ;;  %p2837_p1 = scmp.lt.s32.totalorder %s2232_s10, %s2232_s10 }
 0xa47   :  { %v2412_v0 = vpack.c.bf16 %v1632_v61, %v1632_v61  ;;  %2701 = vmatprep.subr.bf16.mxu1 %v2854_v15 }
 0xa49   :  { %v1766_v3 = vsel %vm318_vm2, %v2412_v0, 0 }
 0xa4a   :  { %2696 = vmatpush3.bf16.xpose.msra.mxu0 %v1766_v3 }
 0xa4b   :  { %2707 = vmatprep.subr.bf16.mxu0 %v2854_v15 }
 0xa4d   :  { %2692 = vmatmul.mubr.msk.bf16.vlgmr.msra.gmra.mxu1 %vm318_vm2, %v2409_v4 }
 0xa4e   :  { %2702 = vmatpush3.bf16.msra.mxu1 %v1832_v8  ;;  %2703 = vmatprep.mubr.msk.bf16.mxu1 %vm2855_vm1, %v2854_v15 }
 0xa4f   :  { %2713 = vmatprep.subr.bf16.mxu1 %v2854_v15 }
 0xa51   :  { %2698 = vmatmul.mubr.msk.bf16.vlgmr.msra.gmra.mxu0 %vm318_vm2, %v2410_v11 }
 0xa52   :  { %2708 = vmatpush3.bf16.msra.mxu0 %v1878_v12  ;;  %2709 = vmatprep.mubr.msk.bf16.mxu0 %vm2855_vm1, %v2854_v15 }
 0xa53   :  { %2719 = vmatprep.subr.bf16.mxu0 %v2854_v15 }
 0xb0d   :  { %v1756_v13 = vpop.f32.mrf.mxu1 }
 0xb0e   :  { %v1757_v14 = vadd.f32 %v1756_v13, %v3040_v5 }
 0xb0f   :  { %v2693_v16 = vpop.f32.mrf.mxu1 }
 0xb10   :  { %v1808_v17 = vsel %vm318_vm2, %v1757_v14, -inf }
 0xb11   :  { %1809 = vmax.xlane.f32.xlu0 %v1808_v17  ;;  %v1759_v18 = vpop.f32.mrf.mxu1  ;;  %v1802_v19 = vpop.f32.mrf.mxu0  ;;  %v2776_v17 = vld [vmem:[%s3425_s13 + $0x8] sm:$0xff]  }
 0xb12   :  { %v1803_v20 = vadd.f32 %v1802_v19, %v3040_v5  ;;  %v2777_v18 = vld [vmem:[%s3425_s13] sm:$0xff]   ;;  %v2778_v19 = vld [vmem:[%s3427_s15 + $0x38] sm:$0xff]  }
 0xb13   :  { %v2694_v21 = vpop.f32.mrf.mxu1  ;;  %v2699_v22 = vpop.f32.mrf.mxu0 }
 0xb14   :  { %v1811_v23 = vsel %vm318_vm2, %v1803_v20, -inf }
 0xb15   :  { %1812 = vmax.xlane.f32.xlu1 %v1811_v23  ;;  %v1805_v24 = vpop.f32.mrf.mxu0 }
 0xb17   :  { %v2700_v27 = vpop.f32.mrf.mxu0 }
 0xb9a   :  { %v1810_v30 = vpop.xlane.xlu0 %1809 }
 0xb9b   :  { %v1814_v31 = vsub.f32 %v1757_v14, %v1810_v30 }
 0xb9d   :  { %v1816_v32 = vmul.f32 1.442695, %v1814_v31 }
 0xb9e   :  { %v1813_v33 = vpop.xlane.xlu1 %1812 }
 0xb9f   :  { %2814 = vpow2.f32 %v1816_v32  ;;  %v1815_v35 = vsub.f32 %v1803_v20, %v1813_v33  ;;  %v2376_v32 = vld [vmem:[%s3423_s11] ss:$0 sm:$0xff] }
 0xba1   :  { %v1818_v37 = vmul.f32 1.442695, %v1815_v35 }
 0xba3   :  { %2816 = vpow2.f32 %v1818_v37 }
 0xbac   :  { %v2815_v38 = vpop.eup %2814 }
 0xbad   :  { %v1820_v25 = vsel %vm318_vm2, %v2815_v38, 0.0  ;;  %v1826_v40 = vpack.c.bf16 %v2815_v38, %v2815_v38  ;;  %v2377_v38 = vld [vmem:[%s3424_s12] ss:$0 sm:$0xff] }
 0xbae   :  { %1821 = vadd.xlane.f32.xlu0 %v1820_v25 }
 0xbaf   :  { %2704 = vmatmul.mubr.msk.bf16.vlgmr.msra.gmra.mxu1 %vm318_vm2, %v1826_v40 }
 0xbb0   :  { %v2817_v5 = vpop.eup %2816  ;;  %2715 = vmatprep.mubr.msk.bf16.mxu1 %vm2855_vm1, %v2854_v15  ;;  %2714 = vmatpush3.bf16.msra.mxu1 %v1931_v43  ;;  %v2781_v43 = vld [vmem:[%s3427_s15 + $0x20] sm:$0xff]  }
 0xbb1   :  { %v1823_v41 = vsel %vm318_vm2, %v2817_v5, 0.0  ;;  %v1827_v28 = vpack.c.bf16 %v2817_v5, %v2817_v5  ;;  %2727 = vmatprep.subr.bf16.mxu1 %v2854_v15 }
 0xbb2   :  { %1824 = vadd.xlane.f32.xlu1 %v1823_v41 }
 0xbb3   :  { %2710 = vmatmul.mubr.msk.bf16.vlgmr.msra.gmra.mxu0 %vm318_vm2, %v1827_v28  ;;  %v2779_v28 = vld [vmem:[%s3427_s15 + $0x30] sm:$0xff]  }
 0xbb4   :  { %2723 = vmatprep.mubr.msk.bf16.mxu0 %vm2855_vm1, %v2854_v15  ;;  %2720 = vmatpush3.bf16.msra.mxu0 %v2776_v17 }
 0xbb5   :  { %2721 = vmatprep.subr.bf16.mxu0 %v2854_v15 }
 0xbb8   :  { %2722 = vmatpush3.bf16.msra.mxu0 %v2777_v18 }
 0xc37   :  { %v1822_v44 = vpop.xlane.xlu0 %1821 }
 0xc38   :  { %2818 = vrcp.f32 %v1822_v44  ;;  %v2782_v44 = vld [vmem:[%s3427_s15 + $0x18] sm:$0xff]  }
 0xc3b   :  { %v1825_v45 = vpop.xlane.xlu1 %1824 }
 0xc3c   :  { %2820 = vrcp.f32 %v1825_v45  ;;  %v2783_v45 = vld [vmem:[%s3427_s15 + $0x10] sm:$0xff]  }
 0xc45   :  { %v2819_v48 = vpop.eup %2818 }
 0xc49   :  { %v2821_v49 = vpop.eup %2820 }
 0xc6f   :  { %v1868_v46 = vpop.f32.mrf.mxu1 }
 0xc70   :  { %v1922_v36 = vmul.f32 %v2819_v48, %v1868_v46  ;;  %v2784_v46 = vld [vmem:[%s3427_s15 + $0x8] sm:$0xff]   ;;  %v2378_v48 = vld [vmem:[%s3426_s14] ss:$0 sm:$0xff] }
 0xc71   :  { %v2705_v47 = vpop.f32.mrf.mxu1 }
 0xc72   :  { %v2785_v47 = vld [vmem:[%s3427_s15] sm:$0xff]  }
 0xc73   :  { %v1871_v50 = vpop.f32.mrf.mxu1  ;;  %v1914_v51 = vpop.f32.mrf.mxu0 }
 0xc74   :  { %v1923_v39 = vmul.f32 %v2821_v49, %v1914_v51 }
 0xc75   :  { %v2706_v53 = vpop.f32.mrf.mxu1  ;;  %v2711_v54 = vpop.f32.mrf.mxu0 }
 0xc76   :  { %v1924_v55 = vpack.c.bf16 %v1923_v39, %v1922_v36 }
 0xc77   :  { %v1917_v56 = vpop.f32.mrf.mxu0 }
 0xc78   :  { %2716 = vmatmul.mubr.msk.bf16.vlgmr.msra.gmra.mxu1 %vm318_vm2, %v1924_v55 }
 0xc79   :  { %v2712_v57 = vpop.f32.mrf.mxu0  ;;  %2743 = vmatprep.mubr.msk.bf16.mxu1 %vm2855_vm1, %v2854_v15  ;;  %2728 = vmatpush3.bf16.msra.mxu1 %v2778_v19 }
 0xc7a   :  { %2729 = vmatprep.subr.bf16.mxu1 %v2854_v15 }
 0xc7d   :  { %2730 = vmatpush3.bf16.msra.mxu1 %v2779_v28 }
 0xc7e   :  { %2731 = vmatprep.subr.bf16.mxu1 %v2854_v15 }
 0xc81   :  { %2732 = vmatpush3.bf16.msra.mxu1 %v2780_v42 }
 0xc82   :  { %2733 = vmatprep.subr.bf16.mxu1 %v2854_v15 }
 0xc85   :  { %2734 = vmatpush3.bf16.msra.mxu1 %v2781_v43 }
 0xc86   :  { %2735 = vmatprep.subr.bf16.mxu1 %v2854_v15 }
 0xc89   :  { %2736 = vmatpush3.bf16.msra.mxu1 %v2782_v44 }
 0xc8a   :  { %2737 = vmatprep.subr.bf16.mxu1 %v2854_v15 }
 0xc8d   :  { %2738 = vmatpush3.bf16.msra.mxu1 %v2783_v45 }
 0xc8e   :  { %2739 = vmatprep.subr.bf16.mxu1 %v2854_v15 }
 0xc91   :  { %2740 = vmatpush3.bf16.msra.mxu1 %v2784_v46 }
 0xc92   :  { %2741 = vmatprep.subr.bf16.mxu1 %v2854_v15 }
 0xc95   :  { %2742 = vmatpush3.bf16.msra.mxu1 %v2785_v47 }
 0xd38   :  { %v1967_v7 = vpop.f32.mrf.mxu1 }
 0xd39   :  { %v1974_v26 = vadd.f32 %v1967_v7, %v3282_v52  ;;  %v2831_v52 = vld [vmem:[%s3435_s29 + $0x8] sm:$0xff]  ;;  %s2832_s29 = scalar_lea.vmem %s2232_s10, 256 }
 0xd3a   :  { %v2717_v10 = vpop.f32.mrf.mxu1  ;;  %p2833_p0 = scmp.ne.s32.totalorder %s2232_s10, %s2832_s29  ;;  %p2838_p2 = scmp.lt.s32.totalorder %s2832_s29, %s2832_s29 }
 0xd3b   :  { %v1976_v59 = vadd.f32 %v2830_v29, %v1974_v26 }
 0xd3c   :  { %v1970_v60 = vpop.f32.mrf.mxu1  ;;  %p2839_p3 = por %p2838_p2, %p2837_p1 }
 0xd3d   :  { %v3338_v61 = vadd.f32 %v2375_v58, %v1976_v59  ;;  %v1975_v62 = vadd.f32 %v1970_v60, %v3286_v34  ;;  %v2382_v60 = vld [vmem:[%s3428_s16] ss:$0 sm:$0xff] }
 0xd3e   :  { %v2718_v63 = vpop.f32.mrf.mxu1  ;;  %p2840_p4 = pnand %p2839_p3, %p2833_p0 }
 0xd3f   :  { %v1977_v0 = vadd.f32 %v2831_v52, %v1975_v62  ;;  %v1989_v1 = vsel %vm65_vm0, %v3338_v61, 0.0 }
 0xd40   :  { %1990 = vadd.xlane.f32.xlu0 %v1989_v1 }
 0xd41   :  { %v3346_v2 = vadd.f32 %v2375_v58, %v1977_v0 }
 0xd43   :  { %v1992_v3 = vsel %vm65_vm0, %v3346_v2, 0.0 }
 0xd44   :  { %1993 = vadd.xlane.f32.xlu1 %v1992_v3 }
 0xdc9   :  { %v1991_v4 = vpop.xlane.xlu0 %1990 }
 0xdca   :  { %v1995_v6 = vmul.f32 0.03125, %v1991_v4 }
 0xdcc   :  { %v1997_v34 = vsub.f32 %v3338_v61, %v1995_v6 }
 0xdcd   :  { %v1994_v8 = vpop.xlane.xlu1 %1993 }
 0xdce   :  { %v1996_v9 = vmul.f32 0.03125, %v1994_v8  ;;  %v1999_v11 = vmul.f32 %v1997_v34, %v1997_v34 }
 0xdd0   :  { %v1998_v12 = vsub.f32 %v3346_v2, %v1996_v9  ;;  %v2001_v13 = vsel %vm65_vm0, %v1999_v11, 0.0 }
 0xdd1   :  { %2002 = vadd.xlane.f32.xlu0 %v2001_v13 }
 0xdd2   :  { %v2000_v14 = vmul.f32 %v1998_v12, %v1998_v12 }
 0xdd4   :  { %v2004_v16 = vsel %vm65_vm0, %v2000_v14, 0.0 }
 0xdd5   :  { %2005 = vadd.xlane.f32.xlu1 %v2004_v16 }
 0xe5a   :  { %v2003_v20 = vpop.xlane.xlu0 %2002 }
 0xe5b   :  { %v2007_v21 = vmul.f32 0.03125, %v2003_v20 }
 0xe5d   :  { %v2009_v22 = vadd.f32 1e-05, %v2007_v21 }
 0xe5e   :  { %v2006_v23 = vpop.xlane.xlu1 %2005 }
 0xe5f   :  { %2822 = vrsqrt.f32 %v2009_v22  ;;  %v2008_v24 = vmul.f32 0.03125, %v2006_v23 }
 0xe61   :  { %v2010_v27 = vadd.f32 1e-05, %v2008_v24 }
 0xe63   :  { %2824 = vrsqrt.f32 %v2010_v27 }
 0xe6c   :  { %v2823_v30 = vpop.eup %2822 }
 0xe6d   :  { %v2013_v31 = vmul.f32 %v2823_v30, %v1997_v34 }
 0xe6f   :  { %v2021_v37 = vmul.f32 %v2376_v32, %v2013_v31 }
 0xe70   :  { %v2825_v33 = vpop.eup %2824 }
 0xe71   :  { %v2014_v35 = vmul.f32 %v2825_v33, %v1998_v12  ;;  %v2029_v40 = vadd.f32 %v2377_v38, %v2021_v37 }
 0xe73   :  { %v2022_v25 = vmul.f32 %v2376_v32, %v2014_v35 }
 0xe75   :  { %v2030_v5 = vadd.f32 %v2377_v38, %v2022_v25 }
 0xe77   :  { %v2031_v41 = vpack.c.bf16 %v2030_v5, %v2029_v40 }
 0xe79   :  { %2724 = vmatmul.mubr.msk.bf16.vlgmr.msra.gmra.mxu0 %vm65_vm0, %v2031_v41 }
 0xf39   :  { %v2092_v49 = vpop.f32.mrf.mxu0 }
 0xf3a   :  { %v2093_v50 = vadd.f32 %v2378_v48, %v2092_v49 }
 0xf3b   :  { %v2725_v51 = vpop.f32.mrf.mxu0 }
 0xf3c   :  { %v2101_v36 = vmul.f32 0.70710677, %v2093_v50  ;;  %v2099_v7 = vmul.f32 0.5, %v2093_v50 }
 0xf3d   :  { %v2095_v39 = vpop.f32.mrf.mxu0 }
 0xf3e   :  { %2826 = verf.f32 %v2101_v36  ;;  %v2096_v53 = vadd.f32 %v2378_v48, %v2095_v39 }
 0xf3f   :  { %v2726_v54 = vpop.f32.mrf.mxu0 }
 0xf40   :  { %v2102_v55 = vmul.f32 0.70710677, %v2096_v53  ;;  %v2100_v26 = vmul.f32 0.5, %v2096_v53 }
 0xf42   :  { %2828 = verf.f32 %v2102_v55 }
 0xf4b   :  { %v2827_v15 = vpop.eup %2826 }
 0xf4c   :  { %v2105_v56 = vadd.f32 1.0, %v2827_v15 }
 0xf4e   :  { %v2107_v10 = vmul.f32 %v2105_v56, %v2099_v7 }
 0xf4f   :  { %v2829_v57 = vpop.eup %2828 }
 0xf50   :  { %v2106_v58 = vadd.f32 1.0, %v2829_v57 }
 0xf52   :  { %v2108_v29 = vmul.f32 %v2106_v58, %v2100_v26 }
 0xf54   :  { %v2109_v59 = vpack.c.bf16 %v2108_v29, %v2107_v10 }
 0xf56   :  { %2744 = vmatmul.mubr.bf16.vlgmr.msra.gmra.mxu1 %v2109_v59 }
0x1016   :  { %v2215_v62 = vpop.f32.mrf.mxu1 }
0x1017   :  { %v2216_v63 = vadd.f32 %v2382_v60, %v2215_v62 }
0x1018   :  { %v2745_v52 = vpop.f32.mrf.mxu1 }
0x1019   :  { %v2222_v0 = vadd.f32 %v2216_v63, %v3338_v61 }
0x101a   :  { %v2218_v1 = vpop.f32.mrf.mxu1 }
0x101b   :  { %2224 = vst.msk [vmem:[#allocation2] sm:$0xff] %vm65_vm0, %v2222_v0  ;;  %v2219_v3 = vadd.f32 %v2382_v60, %v2218_v1 }
0x101c   :  { %v2746_v4 = vpop.f32.mrf.mxu1 }
0x101d   :  { %v2223_v6 = vadd.f32 %v2219_v3, %v3346_v2 }
0x101f   :  { %2225 = vst.msk [vmem:[#allocation2 + $0x8] sm:$0xff] %vm65_vm0, %v2223_v6 }
0x1020   :  { %2843 = shalt.err (!%p2840_p4)
}
0x1021   :  { %s2857_s16 = smov 128   ;;  %s2858_s30 = smov 8  }
0x1022   :  { %2237 = dma.vmem_to_hbm [thread:$0]  %s2232_s10, 256, %s3430_s18, [#allocation3], %s2857_s16, %s2857_s16, %s2858_s30  }
0x1023   :  { %2852 = dma.done.wait [#allocation3], 256  }
0x1024   :  { %2853 = vsyncadd [#allocation3], 4294967040 }
0x1025   :  { %2241 = vsyncpa [#allocation3], 1 }

</bundles_post_ra>
